<compile_context>
chip_gen: v5e
topology: v5e:2x2
jax: 0.10.0
libtpu: 0.0.40
codegen_flags: <defaults>
</compile_context>

<pallas_src>
import functools
import math

import jax
import jax.numpy as jnp
from jax import lax
from jax.experimental import pallas as pl
from jax.experimental.pallas import tpu as pltpu


# ------------------------------ fused kernel --------------------------------

def _encoder_kernel(*refs, num_layers, hidden, seq_len, batch):
    """Fused stacked-LSTM + Linear encoder.

    Ref layout (all VMEM):
      refs[0]                x2d   (T*B, input_size)  time-major rows (row = t*B + b)
      refs[1 + 3*l + 0]      wihT  (Din_l, 4H)        W_ih^T, layer l
      refs[1 + 3*l + 1]      whhT  (H, 4H)            W_hh^T, layer l
      refs[1 + 3*l + 2]      bias  (1, 4H)            b_ih + b_hh, layer l
      refs[1 + 3*L + 0]      fc_wT (H, E)
      refs[1 + 3*L + 1]      fc_b  (1, E)
      refs[1 + 3*L + 2]      out   (T*B, E)           output ref
      refs[1 + 3*L + 3]      seq   (T*B, H)           VMEM scratch (layer output)
    Gate order follows PyTorch: i, f, g, o.
    """
    T, B, H = seq_len, batch, hidden
    x2d_ref = refs[0]
    fc_wT_ref = refs[1 + 3 * num_layers]
    fc_b_ref = refs[2 + 3 * num_layers]
    out_ref = refs[3 + 3 * num_layers]
    seq_scr = refs[4 + 3 * num_layers]

    h_seq = x2d_ref[...]                                           # (T*B, Din0)

    for layer in range(num_layers):
        wihT = refs[1 + 3 * layer][...]                            # (Din, 4H)
        whhT = refs[2 + 3 * layer][...]                            # (H, 4H)
        bias = refs[3 + 3 * layer][...]                            # (1, 4H)

        # Hoisted input projection (+ bias) for the WHOLE sequence: one big
        # matmul instead of T tiny ones inside the serial recurrence.
        xg = jnp.dot(h_seq, wihT,
                     preferred_element_type=jnp.float32) + bias    # (T*B, 4H)

        h = jnp.zeros((B, H), jnp.float32)
        c = jnp.zeros((B, H), jnp.float32)

        # Fully unrolled time loop (T static) -> static slices, cross-step
        # scheduling visibility for the LLO.
        for t in range(T):
            gates = xg[t * B:(t + 1) * B, :] + jnp.dot(
                h, whhT, preferred_element_type=jnp.float32)       # (B, 4H)
            # Full-vreg nonlinearities once (4H = 128 lanes), then slice.
            sg = jax.nn.sigmoid(gates)
            th = jnp.tanh(gates)
            i_g = sg[:, 0:H]
            f_g = sg[:, H:2 * H]
            g_g = th[:, 2 * H:3 * H]
            o_g = sg[:, 3 * H:4 * H]
            c = f_g * c + i_g * g_g
            h = o_g * jnp.tanh(c)
            seq_scr[pl.ds(t * B, B), :] = h

        h_seq = seq_scr[...]                                       # (T*B, H)

    # Final Linear on the whole sequence slab.
    out_ref[...] = (jnp.dot(h_seq, fc_wT_ref[...],
                            preferred_element_type=jnp.float32)
                    + fc_b_ref[...])


def encoder_forward(params, x):
    """x: (B, T, input_size) batch_first, like the PyTorch module. Returns (B, T, E)."""
    B, T, Din = x.shape
    H = params["lstm"][0]["whhT"].shape[0]
    E = params["fc"]["wT"].shape[1]
    num_layers = len(params["lstm"])

    # Single tiny layout op: batch_first -> time-major 2D slab (row = t*B + b).
    x2d = jnp.transpose(x, (1, 0, 2)).reshape(T * B, Din)

    flat_inputs = [x2d]
    for lp in params["lstm"]:
        flat_inputs += [lp["wihT"], lp["whhT"], lp["b"]]
    flat_inputs += [params["fc"]["wT"], params["fc"]["b"]]

    out2d = pl.pallas_call(
        functools.partial(_encoder_kernel, num_layers=num_layers, hidden=H,
                          seq_len=T, batch=B),
        out_shape=jax.ShapeDtypeStruct((T * B, E), jnp.float32),
        in_specs=[pl.BlockSpec(memory_space=pltpu.MemorySpace.VMEM)]
                 * len(flat_inputs),
        out_specs=pl.BlockSpec(memory_space=pltpu.MemorySpace.VMEM),
        scratch_shapes=[pltpu.VMEM((T * B, H), jnp.float32)],
    )(*flat_inputs)

    return jnp.transpose(out2d.reshape(T, B, E), (1, 0, 2))        # (B, T, E)


# ------------------------------ parameter init ------------------------------

def init_encoder_params(key, input_size, hidden_size1, embed_size, num_layers):
    """Matches PyTorch nn.LSTM / nn.Linear init ranges; weights pre-transposed."""
    layers = []
    k = 1.0 / math.sqrt(hidden_size1)
    for layer in range(num_layers):
        din = input_size if layer == 0 else hidden_size1
        key, k1, k2, k3, k4 = jax.random.split(key, 5)
        wih = jax.random.uniform(k1, (4 * hidden_size1, din), jnp.float32, -k, k)
        whh = jax.random.uniform(k2, (4 * hidden_size1, hidden_size1),
                                 jnp.float32, -k, k)
        bih = jax.random.uniform(k3, (4 * hidden_size1,), jnp.float32, -k, k)
        bhh = jax.random.uniform(k4, (4 * hidden_size1,), jnp.float32, -k, k)
        layers.append({"wihT": wih.T, "whhT": whh.T, "b": (bih + bhh)[None, :]})

    kf = 1.0 / math.sqrt(hidden_size1)
    key, k1, k2 = jax.random.split(key, 3)
    w = jax.random.uniform(k1, (embed_size, hidden_size1), jnp.float32, -kf, kf)
    b = jax.random.uniform(k2, (embed_size,), jnp.float32, -kf, kf)
    return {"lstm": layers, "fc": {"wT": w.T, "b": b[None, :]}}


# ---------------------------- pure-JAX reference -----------------------------

def encoder_forward_ref(params, x):
    B, T, _ = x.shape
    h_tbf = jnp.transpose(x, (1, 0, 2))                            # (T, B, Din)
    for lp in params["lstm"]:
        H = lp["whhT"].shape[0]
        wihT, whhT, bias = lp["wihT"], lp["whhT"], lp["b"]

        def step(carry, x_t, wihT=wihT, whhT=whhT, bias=bias, H=H):
            h, c = carry
            gates = x_t @ wihT + h @ whhT + bias
            i = jax.nn.sigmoid(gates[:, :H])
            f = jax.nn.sigmoid(gates[:, H:2 * H])
            g = jnp.tanh(gates[:, 2 * H:3 * H])
            o = jax.nn.sigmoid(gates[:, 3 * H:])
            c = f * c + i * g
            h = o * jnp.tanh(c)
            return (h, c), h

        init = (jnp.zeros((B, H), jnp.float32), jnp.zeros((B, H), jnp.float32))
        _, h_tbf = lax.scan(step, init, h_tbf)

    out2d = h_tbf.reshape(T * B, -1) @ params["fc"]["wT"] + params["fc"]["b"]
    return jnp.transpose(out2d.reshape(T, B, -1), (1, 0, 2))


# ----------------------------------- main ------------------------------------

if __name__ == "__main__":
    B, T = 2, 8
    input_size, hidden_size1, embed_size, num_layers = 16, 32, 16, 2

    key = jax.random.PRNGKey(0)
    kx, kp = jax.random.split(key)
    x = jax.random.normal(kx, (B, T, input_size), jnp.float32)

    params = init_encoder_params(kp, input_size, hidden_size1, embed_size,
                                 num_layers)

    out = encoder_forward(params, x)
    out = jax.block_until_ready(out)

    ref = encoder_forward_ref(params, x)
    assert out.shape == ref.shape == (B, T, embed_size), (out.shape, ref.shape)
    assert jnp.allclose(out, ref, rtol=1e-4, atol=1e-4), \
        float(jnp.max(jnp.abs(out - ref)))

    print("KERNEL_OK")
</pallas_src>

<mosaic_0001>
module attributes {stable_mosaic.version = 11 : i64} {
  func.func @_encoder_kernel(%arg0: memref<16x16xf32, #tpu.memory_space<vmem>>, %arg1: memref<16x128xf32, #tpu.memory_space<vmem>>, %arg2: memref<32x128xf32, #tpu.memory_space<vmem>>, %arg3: memref<1x128xf32, #tpu.memory_space<vmem>>, %arg4: memref<32x128xf32, #tpu.memory_space<vmem>>, %arg5: memref<32x128xf32, #tpu.memory_space<vmem>>, %arg6: memref<1x128xf32, #tpu.memory_space<vmem>>, %arg7: memref<32x16xf32, #tpu.memory_space<vmem>>, %arg8: memref<1x16xf32, #tpu.memory_space<vmem>>, %arg9: memref<16x16xf32, #tpu.memory_space<vmem>>, %arg10: memref<16x32xf32, #tpu.memory_space<vmem>>) attributes {dimension_semantics = [], scalar_prefetch = 0 : i64, scratch_operands = 1 : i64, tpu.core_type = #tpu.core_type<tc>} {
    %c0 = arith.constant 0 : index
    %c0_0 = arith.constant 0 : index
    %0 = vector.load %arg0[%c0, %c0_0] : memref<16x16xf32, #tpu.memory_space<vmem>>, vector<16x16xf32>
    %c0_1 = arith.constant 0 : index
    %c0_2 = arith.constant 0 : index
    %1 = vector.load %arg1[%c0_1, %c0_2] : memref<16x128xf32, #tpu.memory_space<vmem>>, vector<16x128xf32>
    %c0_3 = arith.constant 0 : index
    %c0_4 = arith.constant 0 : index
    %2 = vector.load %arg2[%c0_3, %c0_4] : memref<32x128xf32, #tpu.memory_space<vmem>>, vector<32x128xf32>
    %c0_5 = arith.constant 0 : index
    %c0_6 = arith.constant 0 : index
    %3 = vector.load %arg3[%c0_5, %c0_6] : memref<1x128xf32, #tpu.memory_space<vmem>>, vector<1x128xf32>
    %cst = arith.constant dense<0.000000e+00> : vector<16x128xf32>
    %4 = tpu.matmul %0, %1, %cst {dimension_numbers = #tpu.dot_dimension_numbers<[1], [0], [0], [1], [0, 0, 1, 1], [], []>} : vector<16x16xf32>, vector<16x128xf32>, vector<16x128xf32> -> vector<16x128xf32>
    %5 = vector.broadcast %3 : vector<1x128xf32> to vector<16x128xf32>
    %6 = arith.addf %4, %5 : vector<16x128xf32>
    %cst_7 = arith.constant 0.000000e+00 : f32
    %7 = vector.broadcast %cst_7 : f32 to vector<2x32xf32>
    %cst_8 = arith.constant 0.000000e+00 : f32
    %8 = vector.broadcast %cst_8 : f32 to vector<2x32xf32>
    %9 = vector.extract_strided_slice %6 {offsets = [0, 0], sizes = [2, 128], strides = [1, 1]} : vector<16x128xf32> to vector<2x128xf32>
    %cst_9 = arith.constant dense<0.000000e+00> : vector<2x128xf32>
    %10 = tpu.matmul %7, %2, %cst_9 {dimension_numbers = #tpu.dot_dimension_numbers<[1], [0], [0], [1], [0, 0, 1, 1], [], []>} : vector<2x32xf32>, vector<32x128xf32>, vector<2x128xf32> -> vector<2x128xf32>
    %11 = arith.addf %9, %10 : vector<2x128xf32>
    %12 = arith.negf %11 : vector<2x128xf32>
    %13 = math.exp %12 : vector<2x128xf32>
    %cst_10 = arith.constant 1.000000e+00 : f32
    %14 = vector.broadcast %cst_10 : f32 to vector<2x128xf32>
    %15 = arith.addf %14, %13 : vector<2x128xf32>
    %16 = arith.divf %14, %15 : vector<2x128xf32>
    %17 = math.tanh %11 : vector<2x128xf32>
    %18 = vector.extract_strided_slice %16 {offsets = [0, 0], sizes = [2, 32], strides = [1, 1]} : vector<2x128xf32> to vector<2x32xf32>
    %19 = vector.extract_strided_slice %16 {offsets = [0, 32], sizes = [2, 32], strides = [1, 1]} : vector<2x128xf32> to vector<2x32xf32>
    %20 = vector.extract_strided_slice %17 {offsets = [0, 64], sizes = [2, 32], strides = [1, 1]} : vector<2x128xf32> to vector<2x32xf32>
    %21 = vector.extract_strided_slice %16 {offsets = [0, 96], sizes = [2, 32], strides = [1, 1]} : vector<2x128xf32> to vector<2x32xf32>
    %22 = arith.mulf %19, %8 : vector<2x32xf32>
    %23 = arith.mulf %18, %20 : vector<2x32xf32>
    %24 = arith.addf %22, %23 : vector<2x32xf32>
    %25 = math.tanh %24 : vector<2x32xf32>
    %26 = arith.mulf %21, %25 : vector<2x32xf32>
    %c0_11 = arith.constant 0 : index
    %c0_12 = arith.constant 0 : index
    %27 = vector.load %arg10[%c0_11, %c0_12] : memref<16x32xf32, #tpu.memory_space<vmem>>, vector<2x32xf32>
    tpu.vector_store %arg10[%c0_11, %c0_12], %26 {strides = array<i32>} : memref<16x32xf32, #tpu.memory_space<vmem>>, vector<2x32xf32>,
    %28 = vector.extract_strided_slice %6 {offsets = [2, 0], sizes = [2, 128], strides = [1, 1]} : vector<16x128xf32> to vector<2x128xf32>
    %cst_13 = arith.constant dense<0.000000e+00> : vector<2x128xf32>
    %29 = tpu.matmul %26, %2, %cst_13 {dimension_numbers = #tpu.dot_dimension_numbers<[1], [0], [0], [1], [0, 0, 1, 1], [], []>} : vector<2x32xf32>, vector<32x128xf32>, vector<2x128xf32> -> vector<2x128xf32>
    %30 = arith.addf %28, %29 : vector<2x128xf32>
    %31 = arith.negf %30 : vector<2x128xf32>
    %32 = math.exp %31 : vector<2x128xf32>
    %cst_14 = arith.constant 1.000000e+00 : f32
    %33 = vector.broadcast %cst_14 : f32 to vector<2x128xf32>
    %34 = arith.addf %33, %32 : vector<2x128xf32>
    %35 = arith.divf %33, %34 : vector<2x128xf32>
    %36 = math.tanh %30 : vector<2x128xf32>
    %37 = vector.extract_strided_slice %35 {offsets = [0, 0], sizes = [2, 32], strides = [1, 1]} : vector<2x128xf32> to vector<2x32xf32>
    %38 = vector.extract_strided_slice %35 {offsets = [0, 32], sizes = [2, 32], strides = [1, 1]} : vector<2x128xf32> to vector<2x32xf32>
    %39 = vector.extract_strided_slice %36 {offsets = [0, 64], sizes = [2, 32], strides = [1, 1]} : vector<2x128xf32> to vector<2x32xf32>
    %40 = vector.extract_strided_slice %35 {offsets = [0, 96], sizes = [2, 32], strides = [1, 1]} : vector<2x128xf32> to vector<2x32xf32>
    %41 = arith.mulf %38, %24 : vector<2x32xf32>
    %42 = arith.mulf %37, %39 : vector<2x32xf32>
    %43 = arith.addf %41, %42 : vector<2x32xf32>
    %44 = math.tanh %43 : vector<2x32xf32>
    %45 = arith.mulf %40, %44 : vector<2x32xf32>
    %c2 = arith.constant 2 : index
    %c0_15 = arith.constant 0 : index
    %46 = vector.load %arg10[%c2, %c0_15] : memref<16x32xf32, #tpu.memory_space<vmem>>, vector<2x32xf32>
    tpu.vector_store %arg10[%c2, %c0_15], %45 {strides = array<i32>} : memref<16x32xf32, #tpu.memory_space<vmem>>, vector<2x32xf32>,
    %47 = vector.extract_strided_slice %6 {offsets = [4, 0], sizes = [2, 128], strides = [1, 1]} : vector<16x128xf32> to vector<2x128xf32>
    %cst_16 = arith.constant dense<0.000000e+00> : vector<2x128xf32>
    %48 = tpu.matmul %45, %2, %cst_16 {dimension_numbers = #tpu.dot_dimension_numbers<[1], [0], [0], [1], [0, 0, 1, 1], [], []>} : vector<2x32xf32>, vector<32x128xf32>, vector<2x128xf32> -> vector<2x128xf32>
    %49 = arith.addf %47, %48 : vector<2x128xf32>
    %50 = arith.negf %49 : vector<2x128xf32>
    %51 = math.exp %50 : vector<2x128xf32>
    %cst_17 = arith.constant 1.000000e+00 : f32
    %52 = vector.broadcast %cst_17 : f32 to vector<2x128xf32>
    %53 = arith.addf %52, %51 : vector<2x128xf32>
    %54 = arith.divf %52, %53 : vector<2x128xf32>
    %55 = math.tanh %49 : vector<2x128xf32>
    %56 = vector.extract_strided_slice %54 {offsets = [0, 0], sizes = [2, 32], strides = [1, 1]} : vector<2x128xf32> to vector<2x32xf32>
    %57 = vector.extract_strided_slice %54 {offsets = [0, 32], sizes = [2, 32], strides = [1, 1]} : vector<2x128xf32> to vector<2x32xf32>
    %58 = vector.extract_strided_slice %55 {offsets = [0, 64], sizes = [2, 32], strides = [1, 1]} : vector<2x128xf32> to vector<2x32xf32>
    %59 = vector.extract_strided_slice %54 {offsets = [0, 96], sizes = [2, 32], strides = [1, 1]} : vector<2x128xf32> to vector<2x32xf32>
    %60 = arith.mulf %57, %43 : vector<2x32xf32>
    %61 = arith.mulf %56, %58 : vector<2x32xf32>
    %62 = arith.addf %60, %61 : vector<2x32xf32>
    %63 = math.tanh %62 : vector<2x32xf32>
    %64 = arith.mulf %59, %63 : vector<2x32xf32>
    %c4 = arith.constant 4 : index
    %c0_18 = arith.constant 0 : index
    %65 = vector.load %arg10[%c4, %c0_18] : memref<16x32xf32, #tpu.memory_space<vmem>>, vector<2x32xf32>
    tpu.vector_store %arg10[%c4, %c0_18], %64 {strides = array<i32>} : memref<16x32xf32, #tpu.memory_space<vmem>>, vector<2x32xf32>,
    %66 = vector.extract_strided_slice %6 {offsets = [6, 0], sizes = [2, 128], strides = [1, 1]} : vector<16x128xf32> to vector<2x128xf32>
    %cst_19 = arith.constant dense<0.000000e+00> : vector<2x128xf32>
    %67 = tpu.matmul %64, %2, %cst_19 {dimension_numbers = #tpu.dot_dimension_numbers<[1], [0], [0], [1], [0, 0, 1, 1], [], []>} : vector<2x32xf32>, vector<32x128xf32>, vector<2x128xf32> -> vector<2x128xf32>
    %68 = arith.addf %66, %67 : vector<2x128xf32>
    %69 = arith.negf %68 : vector<2x128xf32>
    %70 = math.exp %69 : vector<2x128xf32>
    %cst_20 = arith.constant 1.000000e+00 : f32
    %71 = vector.broadcast %cst_20 : f32 to vector<2x128xf32>
    %72 = arith.addf %71, %70 : vector<2x128xf32>
    %73 = arith.divf %71, %72 : vector<2x128xf32>
    %74 = math.tanh %68 : vector<2x128xf32>
    %75 = vector.extract_strided_slice %73 {offsets = [0, 0], sizes = [2, 32], strides = [1, 1]} : vector<2x128xf32> to vector<2x32xf32>
    %76 = vector.extract_strided_slice %73 {offsets = [0, 32], sizes = [2, 32], strides = [1, 1]} : vector<2x128xf32> to vector<2x32xf32>
    %77 = vector.extract_strided_slice %74 {offsets = [0, 64], sizes = [2, 32], strides = [1, 1]} : vector<2x128xf32> to vector<2x32xf32>
    %78 = vector.extract_strided_slice %73 {offsets = [0, 96], sizes = [2, 32], strides = [1, 1]} : vector<2x128xf32> to vector<2x32xf32>
    %79 = arith.mulf %76, %62 : vector<2x32xf32>
    %80 = arith.mulf %75, %77 : vector<2x32xf32>
    %81 = arith.addf %79, %80 : vector<2x32xf32>
    %82 = math.tanh %81 : vector<2x32xf32>
    %83 = arith.mulf %78, %82 : vector<2x32xf32>
    %c6 = arith.constant 6 : index
    %c0_21 = arith.constant 0 : index
    %84 = vector.load %arg10[%c6, %c0_21] : memref<16x32xf32, #tpu.memory_space<vmem>>, vector<2x32xf32>
    tpu.vector_store %arg10[%c6, %c0_21], %83 {strides = array<i32>} : memref<16x32xf32, #tpu.memory_space<vmem>>, vector<2x32xf32>,
    %85 = vector.extract_strided_slice %6 {offsets = [8, 0], sizes = [2, 128], strides = [1, 1]} : vector<16x128xf32> to vector<2x128xf32>
    %cst_22 = arith.constant dense<0.000000e+00> : vector<2x128xf32>
    %86 = tpu.matmul %83, %2, %cst_22 {dimension_numbers = #tpu.dot_dimension_numbers<[1], [0], [0], [1], [0, 0, 1, 1], [], []>} : vector<2x32xf32>, vector<32x128xf32>, vector<2x128xf32> -> vector<2x128xf32>
    %87 = arith.addf %85, %86 : vector<2x128xf32>
    %88 = arith.negf %87 : vector<2x128xf32>
    %89 = math.exp %88 : vector<2x128xf32>
    %cst_23 = arith.constant 1.000000e+00 : f32
    %90 = vector.broadcast %cst_23 : f32 to vector<2x128xf32>
    %91 = arith.addf %90, %89 : vector<2x128xf32>
    %92 = arith.divf %90, %91 : vector<2x128xf32>
    %93 = math.tanh %87 : vector<2x128xf32>
    %94 = vector.extract_strided_slice %92 {offsets = [0, 0], sizes = [2, 32], strides = [1, 1]} : vector<2x128xf32> to vector<2x32xf32>
    %95 = vector.extract_strided_slice %92 {offsets = [0, 32], sizes = [2, 32], strides = [1, 1]} : vector<2x128xf32> to vector<2x32xf32>
    %96 = vector.extract_strided_slice %93 {offsets = [0, 64], sizes = [2, 32], strides = [1, 1]} : vector<2x128xf32> to vector<2x32xf32>
    %97 = vector.extract_strided_slice %92 {offsets = [0, 96], sizes = [2, 32], strides = [1, 1]} : vector<2x128xf32> to vector<2x32xf32>
    %98 = arith.mulf %95, %81 : vector<2x32xf32>
    %99 = arith.mulf %94, %96 : vector<2x32xf32>
    %100 = arith.addf %98, %99 : vector<2x32xf32>
    %101 = math.tanh %100 : vector<2x32xf32>
    %102 = arith.mulf %97, %101 : vector<2x32xf32>
    %c8 = arith.constant 8 : index
    %c0_24 = arith.constant 0 : index
    %103 = vector.load %arg10[%c8, %c0_24] : memref<16x32xf32, #tpu.memory_space<vmem>>, vector<2x32xf32>
    tpu.vector_store %arg10[%c8, %c0_24], %102 {strides = array<i32>} : memref<16x32xf32, #tpu.memory_space<vmem>>, vector<2x32xf32>,
    %104 = vector.extract_strided_slice %6 {offsets = [10, 0], sizes = [2, 128], strides = [1, 1]} : vector<16x128xf32> to vector<2x128xf32>
    %cst_25 = arith.constant dense<0.000000e+00> : vector<2x128xf32>
    %105 = tpu.matmul %102, %2, %cst_25 {dimension_numbers = #tpu.dot_dimension_numbers<[1], [0], [0], [1], [0, 0, 1, 1], [], []>} : vector<2x32xf32>, vector<32x128xf32>, vector<2x128xf32> -> vector<2x128xf32>
    %106 = arith.addf %104, %105 : vector<2x128xf32>
    %107 = arith.negf %106 : vector<2x128xf32>
    %108 = math.exp %107 : vector<2x128xf32>
    %cst_26 = arith.constant 1.000000e+00 : f32
    %109 = vector.broadcast %cst_26 : f32 to vector<2x128xf32>
    %110 = arith.addf %109, %108 : vector<2x128xf32>
    %111 = arith.divf %109, %110 : vector<2x128xf32>
    %112 = math.tanh %106 : vector<2x128xf32>
    %113 = vector.extract_strided_slice %111 {offsets = [0, 0], sizes = [2, 32], strides = [1, 1]} : vector<2x128xf32> to vector<2x32xf32>
    %114 = vector.extract_strided_slice %111 {offsets = [0, 32], sizes = [2, 32], strides = [1, 1]} : vector<2x128xf32> to vector<2x32xf32>
    %115 = vector.extract_strided_slice %112 {offsets = [0, 64], sizes = [2, 32], strides = [1, 1]} : vector<2x128xf32> to vector<2x32xf32>
    %116 = vector.extract_strided_slice %111 {offsets = [0, 96], sizes = [2, 32], strides = [1, 1]} : vector<2x128xf32> to vector<2x32xf32>
    %117 = arith.mulf %114, %100 : vector<2x32xf32>
    %118 = arith.mulf %113, %115 : vector<2x32xf32>
    %119 = arith.addf %117, %118 : vector<2x32xf32>
    %120 = math.tanh %119 : vector<2x32xf32>
    %121 = arith.mulf %116, %120 : vector<2x32xf32>
    %c10 = arith.constant 10 : index
    %c0_27 = arith.constant 0 : index
    %122 = vector.load %arg10[%c10, %c0_27] : memref<16x32xf32, #tpu.memory_space<vmem>>, vector<2x32xf32>
    tpu.vector_store %arg10[%c10, %c0_27], %121 {strides = array<i32>} : memref<16x32xf32, #tpu.memory_space<vmem>>, vector<2x32xf32>,
    %123 = vector.extract_strided_slice %6 {offsets = [12, 0], sizes = [2, 128], strides = [1, 1]} : vector<16x128xf32> to vector<2x128xf32>
    %cst_28 = arith.constant dense<0.000000e+00> : vector<2x128xf32>
    %124 = tpu.matmul %121, %2, %cst_28 {dimension_numbers = #tpu.dot_dimension_numbers<[1], [0], [0], [1], [0, 0, 1, 1], [], []>} : vector<2x32xf32>, vector<32x128xf32>, vector<2x128xf32> -> vector<2x128xf32>
    %125 = arith.addf %123, %124 : vector<2x128xf32>
    %126 = arith.negf %125 : vector<2x128xf32>
    %127 = math.exp %126 : vector<2x128xf32>
    %cst_29 = arith.constant 1.000000e+00 : f32
    %128 = vector.broadcast %cst_29 : f32 to vector<2x128xf32>
    %129 = arith.addf %128, %127 : vector<2x128xf32>
    %130 = arith.divf %128, %129 : vector<2x128xf32>
    %131 = math.tanh %125 : vector<2x128xf32>
    %132 = vector.extract_strided_slice %130 {offsets = [0, 0], sizes = [2, 32], strides = [1, 1]} : vector<2x128xf32> to vector<2x32xf32>
    %133 = vector.extract_strided_slice %130 {offsets = [0, 32], sizes = [2, 32], strides = [1, 1]} : vector<2x128xf32> to vector<2x32xf32>
    %134 = vector.extract_strided_slice %131 {offsets = [0, 64], sizes = [2, 32], strides = [1, 1]} : vector<2x128xf32> to vector<2x32xf32>
    %135 = vector.extract_strided_slice %130 {offsets = [0, 96], sizes = [2, 32], strides = [1, 1]} : vector<2x128xf32> to vector<2x32xf32>
    %136 = arith.mulf %133, %119 : vector<2x32xf32>
    %137 = arith.mulf %132, %134 : vector<2x32xf32>
    %138 = arith.addf %136, %137 : vector<2x32xf32>
    %139 = math.tanh %138 : vector<2x32xf32>
    %140 = arith.mulf %135, %139 : vector<2x32xf32>
    %c12 = arith.constant 12 : index
    %c0_30 = arith.constant 0 : index
    %141 = vector.load %arg10[%c12, %c0_30] : memref<16x32xf32, #tpu.memory_space<vmem>>, vector<2x32xf32>
    tpu.vector_store %arg10[%c12, %c0_30], %140 {strides = array<i32>} : memref<16x32xf32, #tpu.memory_space<vmem>>, vector<2x32xf32>,
    %142 = vector.extract_strided_slice %6 {offsets = [14, 0], sizes = [2, 128], strides = [1, 1]} : vector<16x128xf32> to vector<2x128xf32>
    %cst_31 = arith.constant dense<0.000000e+00> : vector<2x128xf32>
    %143 = tpu.matmul %140, %2, %cst_31 {dimension_numbers = #tpu.dot_dimension_numbers<[1], [0], [0], [1], [0, 0, 1, 1], [], []>} : vector<2x32xf32>, vector<32x128xf32>, vector<2x128xf32> -> vector<2x128xf32>
    %144 = arith.addf %142, %143 : vector<2x128xf32>
    %145 = arith.negf %144 : vector<2x128xf32>
    %146 = math.exp %145 : vector<2x128xf32>
    %cst_32 = arith.constant 1.000000e+00 : f32
    %147 = vector.broadcast %cst_32 : f32 to vector<2x128xf32>
    %148 = arith.addf %147, %146 : vector<2x128xf32>
    %149 = arith.divf %147, %148 : vector<2x128xf32>
    %150 = math.tanh %144 : vector<2x128xf32>
    %151 = vector.extract_strided_slice %149 {offsets = [0, 0], sizes = [2, 32], strides = [1, 1]} : vector<2x128xf32> to vector<2x32xf32>
    %152 = vector.extract_strided_slice %149 {offsets = [0, 32], sizes = [2, 32], strides = [1, 1]} : vector<2x128xf32> to vector<2x32xf32>
    %153 = vector.extract_strided_slice %150 {offsets = [0, 64], sizes = [2, 32], strides = [1, 1]} : vector<2x128xf32> to vector<2x32xf32>
    %154 = vector.extract_strided_slice %149 {offsets = [0, 96], sizes = [2, 32], strides = [1, 1]} : vector<2x128xf32> to vector<2x32xf32>
    %155 = arith.mulf %152, %138 : vector<2x32xf32>
    %156 = arith.mulf %151, %153 : vector<2x32xf32>
    %157 = arith.addf %155, %156 : vector<2x32xf32>
    %158 = math.tanh %157 : vector<2x32xf32>
    %159 = arith.mulf %154, %158 : vector<2x32xf32>
    %c14 = arith.constant 14 : index
    %c0_33 = arith.constant 0 : index
    %160 = vector.load %arg10[%c14, %c0_33] : memref<16x32xf32, #tpu.memory_space<vmem>>, vector<2x32xf32>
    tpu.vector_store %arg10[%c14, %c0_33], %159 {strides = array<i32>} : memref<16x32xf32, #tpu.memory_space<vmem>>, vector<2x32xf32>,
    %c0_34 = arith.constant 0 : index
    %c0_35 = arith.constant 0 : index
    %161 = vector.load %arg10[%c0_34, %c0_35] : memref<16x32xf32, #tpu.memory_space<vmem>>, vector<16x32xf32>
    %c0_36 = arith.constant 0 : index
    %c0_37 = arith.constant 0 : index
    %162 = vector.load %arg4[%c0_36, %c0_37] : memref<32x128xf32, #tpu.memory_space<vmem>>, vector<32x128xf32>
    %c0_38 = arith.constant 0 : index
    %c0_39 = arith.constant 0 : index
    %163 = vector.load %arg5[%c0_38, %c0_39] : memref<32x128xf32, #tpu.memory_space<vmem>>, vector<32x128xf32>
    %c0_40 = arith.constant 0 : index
    %c0_41 = arith.constant 0 : index
    %164 = vector.load %arg6[%c0_40, %c0_41] : memref<1x128xf32, #tpu.memory_space<vmem>>, vector<1x128xf32>
    %cst_42 = arith.constant dense<0.000000e+00> : vector<16x128xf32>
    %165 = tpu.matmul %161, %162, %cst_42 {dimension_numbers = #tpu.dot_dimension_numbers<[1], [0], [0], [1], [0, 0, 1, 1], [], []>} : vector<16x32xf32>, vector<32x128xf32>, vector<16x128xf32> -> vector<16x128xf32>
    %166 = vector.broadcast %164 : vector<1x128xf32> to vector<16x128xf32>
    %167 = arith.addf %165, %166 : vector<16x128xf32>
    %cst_43 = arith.constant 0.000000e+00 : f32
    %168 = vector.broadcast %cst_43 : f32 to vector<2x32xf32>
    %cst_44 = arith.constant 0.000000e+00 : f32
    %169 = vector.broadcast %cst_44 : f32 to vector<2x32xf32>
    %170 = vector.extract_strided_slice %167 {offsets = [0, 0], sizes = [2, 128], strides = [1, 1]} : vector<16x128xf32> to vector<2x128xf32>
    %cst_45 = arith.constant dense<0.000000e+00> : vector<2x128xf32>
    %171 = tpu.matmul %168, %163, %cst_45 {dimension_numbers = #tpu.dot_dimension_numbers<[1], [0], [0], [1], [0, 0, 1, 1], [], []>} : vector<2x32xf32>, vector<32x128xf32>, vector<2x128xf32> -> vector<2x128xf32>
    %172 = arith.addf %170, %171 : vector<2x128xf32>
    %173 = arith.negf %172 : vector<2x128xf32>
    %174 = math.exp %173 : vector<2x128xf32>
    %cst_46 = arith.constant 1.000000e+00 : f32
    %175 = vector.broadcast %cst_46 : f32 to vector<2x128xf32>
    %176 = arith.addf %175, %174 : vector<2x128xf32>
    %177 = arith.divf %175, %176 : vector<2x128xf32>
    %178 = math.tanh %172 : vector<2x128xf32>
    %179 = vector.extract_strided_slice %177 {offsets = [0, 0], sizes = [2, 32], strides = [1, 1]} : vector<2x128xf32> to vector<2x32xf32>
    %180 = vector.extract_strided_slice %177 {offsets = [0, 32], sizes = [2, 32], strides = [1, 1]} : vector<2x128xf32> to vector<2x32xf32>
    %181 = vector.extract_strided_slice %178 {offsets = [0, 64], sizes = [2, 32], strides = [1, 1]} : vector<2x128xf32> to vector<2x32xf32>
    %182 = vector.extract_strided_slice %177 {offsets = [0, 96], sizes = [2, 32], strides = [1, 1]} : vector<2x128xf32> to vector<2x32xf32>
    %183 = arith.mulf %180, %169 : vector<2x32xf32>
    %184 = arith.mulf %179, %181 : vector<2x32xf32>
    %185 = arith.addf %183, %184 : vector<2x32xf32>
    %186 = math.tanh %185 : vector<2x32xf32>
    %187 = arith.mulf %182, %186 : vector<2x32xf32>
    %c0_47 = arith.constant 0 : index
    %c0_48 = arith.constant 0 : index
    %188 = vector.load %arg10[%c0_47, %c0_48] : memref<16x32xf32, #tpu.memory_space<vmem>>, vector<2x32xf32>
    tpu.vector_store %arg10[%c0_47, %c0_48], %187 {strides = array<i32>} : memref<16x32xf32, #tpu.memory_space<vmem>>, vector<2x32xf32>,
    %189 = vector.extract_strided_slice %167 {offsets = [2, 0], sizes = [2, 128], strides = [1, 1]} : vector<16x128xf32> to vector<2x128xf32>
    %cst_49 = arith.constant dense<0.000000e+00> : vector<2x128xf32>
    %190 = tpu.matmul %187, %163, %cst_49 {dimension_numbers = #tpu.dot_dimension_numbers<[1], [0], [0], [1], [0, 0, 1, 1], [], []>} : vector<2x32xf32>, vector<32x128xf32>, vector<2x128xf32> -> vector<2x128xf32>
    %191 = arith.addf %189, %190 : vector<2x128xf32>
    %192 = arith.negf %191 : vector<2x128xf32>
    %193 = math.exp %192 : vector<2x128xf32>
    %cst_50 = arith.constant 1.000000e+00 : f32
    %194 = vector.broadcast %cst_50 : f32 to vector<2x128xf32>
    %195 = arith.addf %194, %193 : vector<2x128xf32>
    %196 = arith.divf %194, %195 : vector<2x128xf32>
    %197 = math.tanh %191 : vector<2x128xf32>
    %198 = vector.extract_strided_slice %196 {offsets = [0, 0], sizes = [2, 32], strides = [1, 1]} : vector<2x128xf32> to vector<2x32xf32>
    %199 = vector.extract_strided_slice %196 {offsets = [0, 32], sizes = [2, 32], strides = [1, 1]} : vector<2x128xf32> to vector<2x32xf32>
    %200 = vector.extract_strided_slice %197 {offsets = [0, 64], sizes = [2, 32], strides = [1, 1]} : vector<2x128xf32> to vector<2x32xf32>
    %201 = vector.extract_strided_slice %196 {offsets = [0, 96], sizes = [2, 32], strides = [1, 1]} : vector<2x128xf32> to vector<2x32xf32>
    %202 = arith.mulf %199, %185 : vector<2x32xf32>
    %203 = arith.mulf %198, %200 : vector<2x32xf32>
    %204 = arith.addf %202, %203 : vector<2x32xf32>
    %205 = math.tanh %204 : vector<2x32xf32>
    %206 = arith.mulf %201, %205 : vector<2x32xf32>
    %c2_51 = arith.constant 2 : index
    %c0_52 = arith.constant 0 : index
    %207 = vector.load %arg10[%c2_51, %c0_52] : memref<16x32xf32, #tpu.memory_space<vmem>>, vector<2x32xf32>
    tpu.vector_store %arg10[%c2_51, %c0_52], %206 {strides = array<i32>} : memref<16x32xf32, #tpu.memory_space<vmem>>, vector<2x32xf32>,
    %208 = vector.extract_strided_slice %167 {offsets = [4, 0], sizes = [2, 128], strides = [1, 1]} : vector<16x128xf32> to vector<2x128xf32>
    %cst_53 = arith.constant dense<0.000000e+00> : vector<2x128xf32>
    %209 = tpu.matmul %206, %163, %cst_53 {dimension_numbers = #tpu.dot_dimension_numbers<[1], [0], [0], [1], [0, 0, 1, 1], [], []>} : vector<2x32xf32>, vector<32x128xf32>, vector<2x128xf32> -> vector<2x128xf32>
    %210 = arith.addf %208, %209 : vector<2x128xf32>
    %211 = arith.negf %210 : vector<2x128xf32>
    %212 = math.exp %211 : vector<2x128xf32>
    %cst_54 = arith.constant 1.000000e+00 : f32
    %213 = vector.broadcast %cst_54 : f32 to vector<2x128xf32>
    %214 = arith.addf %213, %212 : vector<2x128xf32>
    %215 = arith.divf %213, %214 : vector<2x128xf32>
    %216 = math.tanh %210 : vector<2x128xf32>
    %217 = vector.extract_strided_slice %215 {offsets = [0, 0], sizes = [2, 32], strides = [1, 1]} : vector<2x128xf32> to vector<2x32xf32>
    %218 = vector.extract_strided_slice %215 {offsets = [0, 32], sizes = [2, 32], strides = [1, 1]} : vector<2x128xf32> to vector<2x32xf32>
    %219 = vector.extract_strided_slice %216 {offsets = [0, 64], sizes = [2, 32], strides = [1, 1]} : vector<2x128xf32> to vector<2x32xf32>
    %220 = vector.extract_strided_slice %215 {offsets = [0, 96], sizes = [2, 32], strides = [1, 1]} : vector<2x128xf32> to vector<2x32xf32>
    %221 = arith.mulf %218, %204 : vector<2x32xf32>
    %222 = arith.mulf %217, %219 : vector<2x32xf32>
    %223 = arith.addf %221, %222 : vector<2x32xf32>
    %224 = math.tanh %223 : vector<2x32xf32>
    %225 = arith.mulf %220, %224 : vector<2x32xf32>
    %c4_55 = arith.constant 4 : index
    %c0_56 = arith.constant 0 : index
    %226 = vector.load %arg10[%c4_55, %c0_56] : memref<16x32xf32, #tpu.memory_space<vmem>>, vector<2x32xf32>
    tpu.vector_store %arg10[%c4_55, %c0_56], %225 {strides = array<i32>} : memref<16x32xf32, #tpu.memory_space<vmem>>, vector<2x32xf32>,
    %227 = vector.extract_strided_slice %167 {offsets = [6, 0], sizes = [2, 128], strides = [1, 1]} : vector<16x128xf32> to vector<2x128xf32>
    %cst_57 = arith.constant dense<0.000000e+00> : vector<2x128xf32>
    %228 = tpu.matmul %225, %163, %cst_57 {dimension_numbers = #tpu.dot_dimension_numbers<[1], [0], [0], [1], [0, 0, 1, 1], [], []>} : vector<2x32xf32>, vector<32x128xf32>, vector<2x128xf32> -> vector<2x128xf32>
    %229 = arith.addf %227, %228 : vector<2x128xf32>
    %230 = arith.negf %229 : vector<2x128xf32>
    %231 = math.exp %230 : vector<2x128xf32>
    %cst_58 = arith.constant 1.000000e+00 : f32
    %232 = vector.broadcast %cst_58 : f32 to vector<2x128xf32>
    %233 = arith.addf %232, %231 : vector<2x128xf32>
    %234 = arith.divf %232, %233 : vector<2x128xf32>
    %235 = math.tanh %229 : vector<2x128xf32>
    %236 = vector.extract_strided_slice %234 {offsets = [0, 0], sizes = [2, 32], strides = [1, 1]} : vector<2x128xf32> to vector<2x32xf32>
    %237 = vector.extract_strided_slice %234 {offsets = [0, 32], sizes = [2, 32], strides = [1, 1]} : vector<2x128xf32> to vector<2x32xf32>
    %238 = vector.extract_strided_slice %235 {offsets = [0, 64], sizes = [2, 32], strides = [1, 1]} : vector<2x128xf32> to vector<2x32xf32>
    %239 = vector.extract_strided_slice %234 {offsets = [0, 96], sizes = [2, 32], strides = [1, 1]} : vector<2x128xf32> to vector<2x32xf32>
    %240 = arith.mulf %237, %223 : vector<2x32xf32>
    %241 = arith.mulf %236, %238 : vector<2x32xf32>
    %242 = arith.addf %240, %241 : vector<2x32xf32>
    %243 = math.tanh %242 : vector<2x32xf32>
    %244 = arith.mulf %239, %243 : vector<2x32xf32>
    %c6_59 = arith.constant 6 : index
    %c0_60 = arith.constant 0 : index
    %245 = vector.load %arg10[%c6_59, %c0_60] : memref<16x32xf32, #tpu.memory_space<vmem>>, vector<2x32xf32>
    tpu.vector_store %arg10[%c6_59, %c0_60], %244 {strides = array<i32>} : memref<16x32xf32, #tpu.memory_space<vmem>>, vector<2x32xf32>,
    %246 = vector.extract_strided_slice %167 {offsets = [8, 0], sizes = [2, 128], strides = [1, 1]} : vector<16x128xf32> to vector<2x128xf32>
    %cst_61 = arith.constant dense<0.000000e+00> : vector<2x128xf32>
    %247 = tpu.matmul %244, %163, %cst_61 {dimension_numbers = #tpu.dot_dimension_numbers<[1], [0], [0], [1], [0, 0, 1, 1], [], []>} : vector<2x32xf32>, vector<32x128xf32>, vector<2x128xf32> -> vector<2x128xf32>
    %248 = arith.addf %246, %247 : vector<2x128xf32>
    %249 = arith.negf %248 : vector<2x128xf32>
    %250 = math.exp %249 : vector<2x128xf32>
    %cst_62 = arith.constant 1.000000e+00 : f32
    %251 = vector.broadcast %cst_62 : f32 to vector<2x128xf32>
    %252 = arith.addf %251, %250 : vector<2x128xf32>
    %253 = arith.divf %251, %252 : vector<2x128xf32>
    %254 = math.tanh %248 : vector<2x128xf32>
    %255 = vector.extract_strided_slice %253 {offsets = [0, 0], sizes = [2, 32], strides = [1, 1]} : vector<2x128xf32> to vector<2x32xf32>
    %256 = vector.extract_strided_slice %253 {offsets = [0, 32], sizes = [2, 32], strides = [1, 1]} : vector<2x128xf32> to vector<2x32xf32>
    %257 = vector.extract_strided_slice %254 {offsets = [0, 64], sizes = [2, 32], strides = [1, 1]} : vector<2x128xf32> to vector<2x32xf32>
    %258 = vector.extract_strided_slice %253 {offsets = [0, 96], sizes = [2, 32], strides = [1, 1]} : vector<2x128xf32> to vector<2x32xf32>
    %259 = arith.mulf %256, %242 : vector<2x32xf32>
    %260 = arith.mulf %255, %257 : vector<2x32xf32>
    %261 = arith.addf %259, %260 : vector<2x32xf32>
    %262 = math.tanh %261 : vector<2x32xf32>
    %263 = arith.mulf %258, %262 : vector<2x32xf32>
    %c8_63 = arith.constant 8 : index
    %c0_64 = arith.constant 0 : index
    %264 = vector.load %arg10[%c8_63, %c0_64] : memref<16x32xf32, #tpu.memory_space<vmem>>, vector<2x32xf32>
    tpu.vector_store %arg10[%c8_63, %c0_64], %263 {strides = array<i32>} : memref<16x32xf32, #tpu.memory_space<vmem>>, vector<2x32xf32>,
    %265 = vector.extract_strided_slice %167 {offsets = [10, 0], sizes = [2, 128], strides = [1, 1]} : vector<16x128xf32> to vector<2x128xf32>
    %cst_65 = arith.constant dense<0.000000e+00> : vector<2x128xf32>
    %266 = tpu.matmul %263, %163, %cst_65 {dimension_numbers = #tpu.dot_dimension_numbers<[1], [0], [0], [1], [0, 0, 1, 1], [], []>} : vector<2x32xf32>, vector<32x128xf32>, vector<2x128xf32> -> vector<2x128xf32>
    %267 = arith.addf %265, %266 : vector<2x128xf32>
    %268 = arith.negf %267 : vector<2x128xf32>
    %269 = math.exp %268 : vector<2x128xf32>
    %cst_66 = arith.constant 1.000000e+00 : f32
    %270 = vector.broadcast %cst_66 : f32 to vector<2x128xf32>
    %271 = arith.addf %270, %269 : vector<2x128xf32>
    %272 = arith.divf %270, %271 : vector<2x128xf32>
    %273 = math.tanh %267 : vector<2x128xf32>
    %274 = vector.extract_strided_slice %272 {offsets = [0, 0], sizes = [2, 32], strides = [1, 1]} : vector<2x128xf32> to vector<2x32xf32>
    %275 = vector.extract_strided_slice %272 {offsets = [0, 32], sizes = [2, 32], strides = [1, 1]} : vector<2x128xf32> to vector<2x32xf32>
    %276 = vector.extract_strided_slice %273 {offsets = [0, 64], sizes = [2, 32], strides = [1, 1]} : vector<2x128xf32> to vector<2x32xf32>
    %277 = vector.extract_strided_slice %272 {offsets = [0, 96], sizes = [2, 32], strides = [1, 1]} : vector<2x128xf32> to vector<2x32xf32>
    %278 = arith.mulf %275, %261 : vector<2x32xf32>
    %279 = arith.mulf %274, %276 : vector<2x32xf32>
    %280 = arith.addf %278, %279 : vector<2x32xf32>
    %281 = math.tanh %280 : vector<2x32xf32>
    %282 = arith.mulf %277, %281 : vector<2x32xf32>
    %c10_67 = arith.constant 10 : index
    %c0_68 = arith.constant 0 : index
    %283 = vector.load %arg10[%c10_67, %c0_68] : memref<16x32xf32, #tpu.memory_space<vmem>>, vector<2x32xf32>
    tpu.vector_store %arg10[%c10_67, %c0_68], %282 {strides = array<i32>} : memref<16x32xf32, #tpu.memory_space<vmem>>, vector<2x32xf32>,
    %284 = vector.extract_strided_slice %167 {offsets = [12, 0], sizes = [2, 128], strides = [1, 1]} : vector<16x128xf32> to vector<2x128xf32>
    %cst_69 = arith.constant dense<0.000000e+00> : vector<2x128xf32>
    %285 = tpu.matmul %282, %163, %cst_69 {dimension_numbers = #tpu.dot_dimension_numbers<[1], [0], [0], [1], [0, 0, 1, 1], [], []>} : vector<2x32xf32>, vector<32x128xf32>, vector<2x128xf32> -> vector<2x128xf32>
    %286 = arith.addf %284, %285 : vector<2x128xf32>
    %287 = arith.negf %286 : vector<2x128xf32>
    %288 = math.exp %287 : vector<2x128xf32>
    %cst_70 = arith.constant 1.000000e+00 : f32
    %289 = vector.broadcast %cst_70 : f32 to vector<2x128xf32>
    %290 = arith.addf %289, %288 : vector<2x128xf32>
    %291 = arith.divf %289, %290 : vector<2x128xf32>
    %292 = math.tanh %286 : vector<2x128xf32>
    %293 = vector.extract_strided_slice %291 {offsets = [0, 0], sizes = [2, 32], strides = [1, 1]} : vector<2x128xf32> to vector<2x32xf32>
    %294 = vector.extract_strided_slice %291 {offsets = [0, 32], sizes = [2, 32], strides = [1, 1]} : vector<2x128xf32> to vector<2x32xf32>
    %295 = vector.extract_strided_slice %292 {offsets = [0, 64], sizes = [2, 32], strides = [1, 1]} : vector<2x128xf32> to vector<2x32xf32>
    %296 = vector.extract_strided_slice %291 {offsets = [0, 96], sizes = [2, 32], strides = [1, 1]} : vector<2x128xf32> to vector<2x32xf32>
    %297 = arith.mulf %294, %280 : vector<2x32xf32>
    %298 = arith.mulf %293, %295 : vector<2x32xf32>
    %299 = arith.addf %297, %298 : vector<2x32xf32>
    %300 = math.tanh %299 : vector<2x32xf32>
    %301 = arith.mulf %296, %300 : vector<2x32xf32>
    %c12_71 = arith.constant 12 : index
    %c0_72 = arith.constant 0 : index
    %302 = vector.load %arg10[%c12_71, %c0_72] : memref<16x32xf32, #tpu.memory_space<vmem>>, vector<2x32xf32>
    tpu.vector_store %arg10[%c12_71, %c0_72], %301 {strides = array<i32>} : memref<16x32xf32, #tpu.memory_space<vmem>>, vector<2x32xf32>,
    %303 = vector.extract_strided_slice %167 {offsets = [14, 0], sizes = [2, 128], strides = [1, 1]} : vector<16x128xf32> to vector<2x128xf32>
    %cst_73 = arith.constant dense<0.000000e+00> : vector<2x128xf32>
    %304 = tpu.matmul %301, %163, %cst_73 {dimension_numbers = #tpu.dot_dimension_numbers<[1], [0], [0], [1], [0, 0, 1, 1], [], []>} : vector<2x32xf32>, vector<32x128xf32>, vector<2x128xf32> -> vector<2x128xf32>
    %305 = arith.addf %303, %304 : vector<2x128xf32>
    %306 = arith.negf %305 : vector<2x128xf32>
    %307 = math.exp %306 : vector<2x128xf32>
    %cst_74 = arith.constant 1.000000e+00 : f32
    %308 = vector.broadcast %cst_74 : f32 to vector<2x128xf32>
    %309 = arith.addf %308, %307 : vector<2x128xf32>
    %310 = arith.divf %308, %309 : vector<2x128xf32>
    %311 = math.tanh %305 : vector<2x128xf32>
    %312 = vector.extract_strided_slice %310 {offsets = [0, 0], sizes = [2, 32], strides = [1, 1]} : vector<2x128xf32> to vector<2x32xf32>
    %313 = vector.extract_strided_slice %310 {offsets = [0, 32], sizes = [2, 32], strides = [1, 1]} : vector<2x128xf32> to vector<2x32xf32>
    %314 = vector.extract_strided_slice %311 {offsets = [0, 64], sizes = [2, 32], strides = [1, 1]} : vector<2x128xf32> to vector<2x32xf32>
    %315 = vector.extract_strided_slice %310 {offsets = [0, 96], sizes = [2, 32], strides = [1, 1]} : vector<2x128xf32> to vector<2x32xf32>
    %316 = arith.mulf %313, %299 : vector<2x32xf32>
    %317 = arith.mulf %312, %314 : vector<2x32xf32>
    %318 = arith.addf %316, %317 : vector<2x32xf32>
    %319 = math.tanh %318 : vector<2x32xf32>
    %320 = arith.mulf %315, %319 : vector<2x32xf32>
    %c14_75 = arith.constant 14 : index
    %c0_76 = arith.constant 0 : index
    %321 = vector.load %arg10[%c14_75, %c0_76] : memref<16x32xf32, #tpu.memory_space<vmem>>, vector<2x32xf32>
    tpu.vector_store %arg10[%c14_75, %c0_76], %320 {strides = array<i32>} : memref<16x32xf32, #tpu.memory_space<vmem>>, vector<2x32xf32>,
    %c0_77 = arith.constant 0 : index
    %c0_78 = arith.constant 0 : index
    %322 = vector.load %arg10[%c0_77, %c0_78] : memref<16x32xf32, #tpu.memory_space<vmem>>, vector<16x32xf32>
    %c0_79 = arith.constant 0 : index
    %c0_80 = arith.constant 0 : index
    %323 = vector.load %arg7[%c0_79, %c0_80] : memref<32x16xf32, #tpu.memory_space<vmem>>, vector<32x16xf32>
    %cst_81 = arith.constant dense<0.000000e+00> : vector<16x16xf32>
    %324 = tpu.matmul %322, %323, %cst_81 {dimension_numbers = #tpu.dot_dimension_numbers<[1], [0], [0], [1], [0, 0, 1, 1], [], []>} : vector<16x32xf32>, vector<32x16xf32>, vector<16x16xf32> -> vector<16x16xf32>
    %c0_82 = arith.constant 0 : index
    %c0_83 = arith.constant 0 : index
    %325 = vector.load %arg8[%c0_82, %c0_83] : memref<1x16xf32, #tpu.memory_space<vmem>>, vector<1x16xf32>
    %326 = vector.broadcast %325 : vector<1x16xf32> to vector<16x16xf32>
    %327 = arith.addf %324, %326 : vector<16x16xf32>
    %c0_84 = arith.constant 0 : index
    %c0_85 = arith.constant 0 : index
    %328 = vector.load %arg9[%c0_84, %c0_85] : memref<16x16xf32, #tpu.memory_space<vmem>>, vector<16x16xf32>
    tpu.vector_store %arg9[%c0_84, %c0_85], %327 {strides = array<i32>} : memref<16x16xf32, #tpu.memory_space<vmem>>, vector<16x16xf32>,
    return
  }
}

</mosaic_0001>

<bundles_post_ra>
// kernel: tpu_custom_call.1
= control target key start
LH: loop header
LB: loop body
LE: loop exit
PB: predicated region body
PF: predicated region fallthrough
CT: control target
= control target key end

     0   :  { %14 = vsyncpa [#allocation4], 0  ;;  %s2010_s0 = inlined_call_operand.vmem [shape: f32[16,16], index: 0, kind: input, shape index: {}]   ;;  %s2011_s1 = inlined_call_operand.hbm [shape: f32[16,128], index: 1, kind: input, shape index: {}]   ;;  %s2012_s2 = inlined_call_operand.vmem [shape: f32[32,128], index: 2, kind: input, shape index: {}]   ;;  %s2013_s3 = inlined_call_operand.vmem [shape: f32[1,128], index: 3, kind: input, shape index: {}]   ;;  %s2014_s4 = inlined_call_operand.hbm [shape: f32[32,128], index: 4, kind: input, shape index: {}]   ;;  %s2015_s5 = inlined_call_operand.hbm [shape: f32[32,128], index: 5, kind: input, shape index: {}]   ;;  %s2016_s6 = inlined_call_operand.vmem [shape: f32[1,128], index: 6, kind: input, shape index: {}]   ;;  %s2017_s7 = inlined_call_operand.vmem [shape: f32[32,16], index: 7, kind: input, shape index: {}]   ;;  %s2018_s8 = inlined_call_operand.vmem [shape: f32[1,16], index: 8, kind: input, shape index: {}]   ;;  %s2019_s9 = inlined_call_operand.hbm [shape: f32[16,16], index: 9, kind: output, shape index: {}]  }
   0x1   :  { %15 = vsyncpa [#allocation7], 0 }
   0x2   :  { %16 = vsyncpa [#allocation5], 0  ;;  %s40_s11 = sshll.u32 %s2014_s4, 4  ;;  %s1658_s12 = smov [#allocation6]   ;;  %s41_s11 = int_to_ptr.hbm [resolvable:$true] %s40_s11 }
   0x3   :  { %s42_s13 = sshll.u32 %s1658_s12, 4  ;;  %s23_s16 = sshll.u32 %s2011_s1, 4  ;;  %s43_s13 = int_to_ptr.vmem [resolvable:$true] %s42_s13  ;;  %s24_s16 = int_to_ptr.hbm [resolvable:$true] %s23_s16 }
   0x4   :  { %s1659_s17 = smov 128   ;;  %s1660_s18 = smov 8  }
   0x5   :  { %48 = dma.hbm_to_vmem [thread:$0]  %s41_s11, 512, %s43_s13, [#allocation7], %s1659_s17, %s1659_s17, %s1660_s18  }
   0x6   :  { %s1661_s19 = smov [#allocation3]   ;;  %s53_s4 = sshll.u32 %s2015_s5, 4  ;;  %s54_s4 = int_to_ptr.hbm [resolvable:$true] %s53_s4 }
   0x7   :  { %s25_s20 = sshll.u32 %s1661_s19, 4  ;;  %s1662_s1 = smov [#allocation8]   ;;  %s26_s20 = int_to_ptr.vmem [resolvable:$true] %s25_s20 }
   0x8   :  { %31 = dma.hbm_to_vmem [thread:$0]  %s24_s16, 256, %s26_s20, [#allocation4], %s1659_s17, %s1659_s17, %s1660_s18  }
   0x9   :  { %s55_s23 = sshll.u32 %s1662_s1, 4  ;;  %s56_s23 = int_to_ptr.vmem [resolvable:$true] %s55_s23 }
   0xa   :  { %61 = dma.hbm_to_vmem [thread:$0]  %s54_s4, 512, %s56_s23, [#allocation7], %s1659_s17, %s1659_s17, %s1660_s18  }
   0xb   :  { %1652 = dma.done.wait [#allocation4], 256  }
   0xc   :  { %1653 = vsyncadd [#allocation4], 4294967040 }
   0xd   :  { %1654 = dma.done.wait [#allocation7], 1024  }
   0xe   :  { %1655 = vsyncadd [#allocation7], 4294966272  ;;  %v83_v0 = vld [vmem:[#allocation3 + $0x8] sm:$0xff]  ;;  %v82_v1 = vld [vmem:[#allocation3] sm:$0xff]  ;;  %vm92_vm0 = vcmask 130048   ;;  %v1663_v8 = vmov 0.0  }
   0xf   :  { %1414 = vmatpush.msra.mxu1 %v83_v0  ;;  %v81_v2 = vld [vmem:[%s2010_s0 + $0x8] sm:$0xff]  ;;  %v87_v3 = vld [vmem:[%s2012_s2 + $0x18] sm:$0xff]  ;;  %113 = vmatpush.msra.mxu0 %v83_v0  ;;  %v80_v4 = vld [vmem:[%s2010_s0] sm:$0xff]  ;;  %s1664_s14 = smov 64   ;;  %vm188_vm5 = vcmask 254976   ;;  %vm122_vm6 = vcmask 261120  }
  0x10   :  { %204 = vmatpush.msra.mxu2 %v87_v3  ;;  %279 = vmatpush.msra.mxu3 %v87_v3  ;;  %v86_v5 = vld [vmem:[%s2012_s2 + $0x10] sm:$0xff]  ;;  %v85_v6 = vld [vmem:[%s2012_s2 + $0x8] sm:$0xff]  ;;  %v84_v7 = vld [vmem:[%s2012_s2] sm:$0xff]  ;;  %s1666_s24 = smov [#allocation9]   ;;  %s1364_s28 = sshll.u32 %s2019_s9, 4  ;;  %s1365_s28 = int_to_ptr.hbm [resolvable:$true] %s1364_s28 }
  0x11   :  { %1415 = vmatpush.msra.mxu1 %v82_v1  ;;  %114 = vmatpush.msra.mxu0 %v82_v1  ;;  %v1425_v9 = vld [vmem:[%s2013_s3] ss:$0 sm:$0xff]  ;;  %s1665_s3 = smov 32   ;;  %s1362_s25 = sshll.u32 %s1666_s24, 4  ;;  %s1363_s25 = int_to_ptr.vmem [resolvable:$true] %s1362_s25 }
  0x12   :  { %1379 = vmatmul.msk.f32.vlgmr.msra.gmra.mxu1 %vm92_vm0, %v81_v2  ;;  %1378 = vmatmul.msk.f32.vlgmr.msra.gmra.mxu0 %vm92_vm0, %v80_v4 }
  0x13   :  { %138 = vmatpush.msrb.mxu1 %v87_v3  ;;  %205 = vmatpush.msra.mxu2 %v86_v5 }
  0x14   :  { %280 = vmatpush.msra.mxu3 %v86_v5  ;;  %571 = vmatpush.msrb.mxu0 %v87_v3 }
  0x15   :  { %139 = vmatpush.msrb.mxu1 %v86_v5  ;;  %206 = vmatpush.msra.mxu2 %v85_v6 }
  0x16   :  { %281 = vmatpush.msra.mxu3 %v85_v6  ;;  %572 = vmatpush.msrb.mxu0 %v86_v5 }
  0x17   :  { %140 = vmatpush.msrb.mxu1 %v85_v6  ;;  %207 = vmatpush.msra.mxu2 %v84_v7 }
  0x18   :  { %282 = vmatpush.msra.mxu3 %v84_v7  ;;  %573 = vmatpush.msrb.mxu0 %v85_v6 }
  0x19   :  { %429 = vmatpush.msrb.mxu2 %v87_v3  ;;  %141 = vmatpush.msrb.mxu1 %v84_v7 }
  0x1a   :  { %497 = vmatpush.msrb.mxu3 %v87_v3  ;;  %142 = vmatmul.f32.vlgmr.msrb.gmra.mxu1 %v1663_v8 }
  0x1b   :  { %430 = vmatpush.msrb.mxu2 %v86_v5  ;;  %354 = vmatpush.msra.mxu1 %v87_v3 }
  0x1c   :  { %498 = vmatpush.msrb.mxu3 %v86_v5  ;;  %574 = vmatpush.msrb.mxu0 %v84_v7 }
  0x1d   :  { %431 = vmatpush.msrb.mxu2 %v85_v6  ;;  %355 = vmatpush.msra.mxu1 %v86_v5 }
  0x1e   :  { %499 = vmatpush.msrb.mxu3 %v85_v6 }
  0x1f   :  { %432 = vmatpush.msrb.mxu2 %v84_v7  ;;  %356 = vmatpush.msra.mxu1 %v85_v6 }
  0x20   :  { %500 = vmatpush.msrb.mxu3 %v84_v7 }
  0x21   :  { %357 = vmatpush.msra.mxu1 %v84_v7 }
  0x23   :  { %645 = vmatpush.msrb.mxu1 %v87_v3 }
  0x25   :  { %646 = vmatpush.msrb.mxu1 %v86_v5 }
  0x27   :  { %647 = vmatpush.msrb.mxu1 %v85_v6 }
  0x29   :  { %648 = vmatpush.msrb.mxu1 %v84_v7 }
  0x8f   :  { %v119_v10 = vpop.f32.mrf.mxu1  ;;  %v116_v12 = vpop.f32.mrf.mxu0 }
  0x90   :  { %v1759_v11 = vadd.f32 %v1425_v9, %v119_v10  ;;  %v1761_v13 = vadd.f32 %v1425_v9, %v116_v12 }
  0x97   :  { %v143_v14 = vpop.f32.mrf.mxu1 }
  0x98   :  { %v146_v15 = vadd.f32 %v143_v14, %v1761_v13 }
  0x9a   :  { %1428 = vtanh.f32 %v146_v15  ;;  %v1380_v17 = vmul.f32 -1.442695, %v146_v15 }
  0x9c   :  { %1430 = vpow2.f32 %v1380_v17 }
  0xa0   :  { %v1429_v16 = vpop.eup %1428 }
  0xa1   :  { %169 = vrot.lane.b32.xlu0 %v1429_v16, %s1664_s14 }
  0xa2   :  { %v1431_v18 = vpop.eup %1430 }
  0xa3   :  { %v150_v19 = vadd.f32 1.0, %v1431_v18 }
  0xa5   :  { %1432 = vrcp.f32 %v150_v19  ;;  %v162_v25 = vand.u32 2147483648, %v150_v19  ;;  %vm156_vm2 = vweird.f32 %v150_v19  ;;  %v160_v26 = vand.u32 2147483647, %v150_v19 }
  0xa7   :  { %v163_v28 = vor.u32 1.1754944e-38, %v162_v25  ;;  %vm161_vm4 = vcmp.eq.f32.partialorder %v160_v26, 8.507059e+37 }
  0xab   :  { %v1433_v20 = vpop.eup %1432 }
  0xac   :  { %v152_v21 = vmul.f32 %v1433_v20, %v150_v19  ;;  %vm157_vm1 = vweird.f32 %v1433_v20 }
  0xad   :  { %vm158_vm3 = vmor %vm156_vm2, %vm157_vm1 }
  0xae   :  { %v153_v22 = vsub.f32 1.0, %v152_v21 }
  0xb0   :  { %v154_v23 = vmul.f32 %v1433_v20, %v153_v22 }
  0xb2   :  { %v155_v24 = vadd.f32 %v1433_v20, %v154_v23 }
  0xb4   :  { %v159_v27 = vsel %vm158_vm3, %v1433_v20, %v155_v24 }
  0xb5   :  { %v164_v30 = vsel %vm161_vm4, %v163_v28, %v159_v27 }
  0xb6   :  { %v167_v32 = vmul.f32 0.0, %v164_v30 }
 0x113   :  { %v170_v29 = vpop.permute.xlu0 %169 }
 0x114   :  { %v172_v31 = vmul.f32 %v170_v29, %v164_v30 }
 0x116   :  { %174 = vrot.lane.b32.xlu0 %v172_v31, %s1665_s3 }
 0x188   :  { %v175_v33 = vpop.permute.xlu0 %174 }
 0x189   :  { %v177_v34 = vadd.f32 %v175_v33, %v167_v32 }
 0x18b   :  { %1434 = vtanh.f32 %v177_v34  ;;  %v237_v58 = vrot.slane %v177_v34, 6 }
 0x191   :  { %v1435_v35 = vpop.eup %1434 }
 0x192   :  { %180 = vrot.lane.b32.xlu1 %v1435_v35, %s1664_s14 }
 0x204   :  { %v181_v36 = vpop.permute.xlu1 %180 }
 0x205   :  { %v183_v37 = vmul.f32 %v181_v36, %v164_v30 }
 0x207   :  { %185 = vrot.lane.b32.xlu1 %v183_v37, %s1665_s3 }
 0x279   :  { %v186_v38 = vpop.permute.xlu1 %185 }
 0x27a   :  { %189 = vst.msk [vmem:[#allocation2] sm:$0x3] %vm188_vm5, %v186_v38  ;;  %1381 = vmatmul.msk.f32.vlgmr.msra.gmra.mxu2 %vm122_vm6, %v186_v38 }
 0x2fd   :  { %v209_v39 = vpop.f32.mrf.mxu2 }
 0x2fe   :  { %v213_v40 = vrot.slane %v209_v39, 6 }
 0x300   :  { %v215_v41 = vadd.f32 %v213_v40, %v1761_v13 }
 0x302   :  { %1436 = vtanh.f32 %v215_v41  ;;  %v1382_v43 = vmul.f32 -1.442695, %v215_v41 }
 0x304   :  { %1438 = vpow2.f32 %v1382_v43 }
 0x308   :  { %v1437_v42 = vpop.eup %1436 }
 0x309   :  { %241 = vrot.lane.b32.xlu2 %v1437_v42, %s1664_s14 }
 0x30a   :  { %v1439_v44 = vpop.eup %1438 }
 0x30b   :  { %v219_v45 = vadd.f32 1.0, %v1439_v44 }
 0x30d   :  { %1440 = vrcp.f32 %v219_v45  ;;  %v231_v51 = vand.u32 2147483648, %v219_v45  ;;  %vm225_vm8 = vweird.f32 %v219_v45  ;;  %v229_v52 = vand.u32 2147483647, %v219_v45 }
 0x30f   :  { %v232_v54 = vor.u32 1.1754944e-38, %v231_v51  ;;  %vm230_vm10 = vcmp.eq.f32.partialorder %v229_v52, 8.507059e+37 }
 0x313   :  { %v1441_v46 = vpop.eup %1440 }
 0x314   :  { %v221_v47 = vmul.f32 %v1441_v46, %v219_v45  ;;  %vm226_vm7 = vweird.f32 %v1441_v46 }
 0x315   :  { %vm227_vm9 = vmor %vm225_vm8, %vm226_vm7 }
 0x316   :  { %v222_v48 = vsub.f32 1.0, %v221_v47 }
 0x318   :  { %v223_v49 = vmul.f32 %v1441_v46, %v222_v48 }
 0x31a   :  { %v224_v50 = vadd.f32 %v1441_v46, %v223_v49 }
 0x31c   :  { %v228_v53 = vsel %vm227_vm9, %v1441_v46, %v224_v50 }
 0x31d   :  { %v233_v56 = vsel %vm230_vm10, %v232_v54, %v228_v53  ;;  %vm260_vm10 = vcmask 257026  }
 0x31e   :  { %v239_v59 = vmul.f32 %v237_v58, %v233_v56 }
 0x363   :  { %v242_v55 = vpop.permute.xlu2 %241 }
 0x364   :  { %v244_v57 = vmul.f32 %v242_v55, %v233_v56 }
 0x366   :  { %246 = vrot.lane.b32.xlu2 %v244_v57, %s1665_s3 }
 0x3c0   :  { %v247_v60 = vpop.permute.xlu2 %246 }
 0x3c1   :  { %v249_v61 = vadd.f32 %v247_v60, %v239_v59 }
 0x3c3   :  { %1442 = vtanh.f32 %v249_v61  ;;  %v312_v25 = vrot.slane %v249_v61, 6 }
 0x3c9   :  { %v1443_v62 = vpop.eup %1442 }
 0x3ca   :  { %252 = vrot.lane.b32.xlu0 %v1443_v62, %s1664_s14 }
 0x43c   :  { %v253_v63 = vpop.permute.xlu0 %252 }
 0x43d   :  { %v1774_v0 = vmul.f32 %v253_v63, %v233_v56 }
 0x43f   :  { %v262_v1 = vrot.slane %v1774_v0, 2 }
 0x441   :  { %263 = vrot.lane.b32.xlu1 %v262_v1, %s1665_s3 }
 0x4b3   :  { %v264_v2 = vpop.permute.xlu1 %263 }
 0x4b4   :  { %1383 = vmatmul.msk.f32.vlgmr.msra.gmra.mxu3 %vm122_vm6, %v264_v2 }
 0x537   :  { %v284_v3 = vpop.f32.mrf.mxu3 }
 0x538   :  { %v288_v4 = vrot.slane %v284_v3, 4 }
 0x53a   :  { %v290_v5 = vadd.f32 %v288_v4, %v1761_v13 }
 0x53c   :  { %1444 = vtanh.f32 %v290_v5  ;;  %v1384_v7 = vmul.f32 -1.442695, %v290_v5 }
 0x53e   :  { %1446 = vpow2.f32 %v1384_v7 }
 0x542   :  { %v1445_v6 = vpop.eup %1444 }
 0x543   :  { %316 = vrot.lane.b32.xlu2 %v1445_v6, %s1664_s14 }
 0x544   :  { %v1447_v9 = vpop.eup %1446 }
 0x545   :  { %v294_v10 = vadd.f32 1.0, %v1447_v9 }
 0x547   :  { %1448 = vrcp.f32 %v294_v10  ;;  %v306_v18 = vand.u32 2147483648, %v294_v10  ;;  %vm300_vm12 = vweird.f32 %v294_v10  ;;  %v304_v19 = vand.u32 2147483647, %v294_v10 }
 0x549   :  { %v307_v21 = vor.u32 1.1754944e-38, %v306_v18  ;;  %vm305_vm14 = vcmp.eq.f32.partialorder %v304_v19, 8.507059e+37 }
 0x54d   :  { %v1449_v12 = vpop.eup %1448 }
 0x54e   :  { %v296_v14 = vmul.f32 %v1449_v12, %v294_v10  ;;  %vm301_vm11 = vweird.f32 %v1449_v12 }
 0x54f   :  { %vm302_vm13 = vmor %vm300_vm12, %vm301_vm11  ;;  %vm335_vm11 = vcmask 259076   ;;  %vm410_vm12 = vcmask 261126  }
 0x550   :  { %v297_v15 = vsub.f32 1.0, %v296_v14 }
 0x552   :  { %v298_v16 = vmul.f32 %v1449_v12, %v297_v15 }
 0x554   :  { %v299_v17 = vadd.f32 %v1449_v12, %v298_v16 }
 0x556   :  { %v303_v20 = vsel %vm302_vm13, %v1449_v12, %v299_v17 }
 0x557   :  { %v308_v23 = vsel %vm305_vm14, %v307_v21, %v303_v20 }
 0x558   :  { %v314_v26 = vmul.f32 %v312_v25, %v308_v23 }
 0x59d   :  { %v317_v22 = vpop.permute.xlu2 %316 }
 0x59e   :  { %v319_v24 = vmul.f32 %v317_v22, %v308_v23 }
 0x5a0   :  { %321 = vrot.lane.b32.xlu0 %v319_v24, %s1665_s3 }
 0x612   :  { %v322_v27 = vpop.permute.xlu0 %321 }
 0x613   :  { %v324_v28 = vadd.f32 %v322_v27, %v314_v26  ;;  %v707_v27 = vld [vmem:[#allocation6 + $0x18] sm:$0xff] }
 0x614   :  { %734 = vmatpush.msra.mxu2 %v707_v27 }
 0x615   :  { %1450 = vtanh.f32 %v324_v28  ;;  %v387_v52 = vrot.slane %v324_v28, 6  ;;  %v706_v28 = vld [vmem:[#allocation6 + $0x10] sm:$0xff] }
 0x616   :  { %735 = vmatpush.msra.mxu2 %v706_v28 }
 0x61b   :  { %v1451_v29 = vpop.eup %1450 }
 0x61c   :  { %327 = vrot.lane.b32.xlu1 %v1451_v29, %s1664_s14  ;;  %v1809_v29 = vld [vmem:[#allocation8 + $0x18] sm:$0xff] }
 0x61d   :  { %757 = vmatpush.msra.mxu3 %v1809_v29  ;;  %822 = vmatpush.msra.mxu0 %v1809_v29 }
 0x68e   :  { %v328_v30 = vpop.permute.xlu1 %327 }
 0x68f   :  { %v1783_v31 = vmul.f32 %v328_v30, %v308_v23  ;;  %v1812_v30 = vld [vmem:[#allocation8 + $0x10] sm:$0xff] }
 0x690   :  { %758 = vmatpush.msra.mxu3 %v1812_v30  ;;  %823 = vmatpush.msra.mxu0 %v1812_v30 }
 0x691   :  { %v337_v32 = vrot.slane %v1783_v31, 4 }
 0x693   :  { %338 = vrot.lane.b32.xlu2 %v337_v32, %s1665_s3  ;;  %v1814_v32 = vld [vmem:[#allocation8 + $0x8] sm:$0xff] }
 0x694   :  { %759 = vmatpush.msra.mxu3 %v1814_v32  ;;  %824 = vmatpush.msra.mxu0 %v1814_v32 }
 0x6ed   :  { %v339_v33 = vpop.permute.xlu2 %338 }
 0x6ee   :  { %1385 = vmatmul.msk.f32.vlgmr.msra.gmra.mxu1 %vm122_vm6, %v339_v33  ;;  %v704_v33 = vld [vmem:[#allocation6] sm:$0xff] }
 0x6ef   :  { %896 = vmatpush.msra.mxu1 %v1809_v29 }
 0x6f1   :  { %897 = vmatpush.msra.mxu1 %v1812_v30 }
 0x6f3   :  { %898 = vmatpush.msra.mxu1 %v1814_v32 }
 0x76b   :  { %v359_v34 = vpop.f32.mrf.mxu1 }
 0x76c   :  { %v363_v35 = vrot.slane %v359_v34, 2  ;;  %v1824_v34 = vld [vmem:[#allocation8] sm:$0xff] }
 0x76d   :  { %760 = vmatpush.msra.mxu3 %v1824_v34  ;;  %825 = vmatpush.msra.mxu0 %v1824_v34 }
 0x76e   :  { %v365_v36 = vadd.f32 %v363_v35, %v1761_v13  ;;  %899 = vmatpush.msra.mxu1 %v1824_v34 }
 0x770   :  { %1452 = vtanh.f32 %v365_v36  ;;  %v1386_v38 = vmul.f32 -1.442695, %v365_v36 }
 0x772   :  { %1454 = vpow2.f32 %v1386_v38 }
 0x776   :  { %v1453_v37 = vpop.eup %1452 }
 0x777   :  { %391 = vrot.lane.b32.xlu0 %v1453_v37, %s1664_s14 }
 0x778   :  { %v1455_v39 = vpop.eup %1454 }
 0x779   :  { %v369_v40 = vadd.f32 1.0, %v1455_v39 }
 0x77b   :  { %1456 = vrcp.f32 %v369_v40  ;;  %v381_v46 = vand.u32 2147483648, %v369_v40  ;;  %vm375_vm1 = vweird.f32 %v369_v40  ;;  %v379_v47 = vand.u32 2147483647, %v369_v40 }
 0x77d   :  { %v382_v48 = vor.u32 1.1754944e-38, %v381_v46  ;;  %vm380_vm3 = vcmp.eq.f32.partialorder %v379_v47, 8.507059e+37 }
 0x781   :  { %v1457_v41 = vpop.eup %1456 }
 0x782   :  { %v371_v42 = vmul.f32 %v1457_v41, %v369_v40  ;;  %vm376_vm15 = vweird.f32 %v1457_v41 }
 0x783   :  { %vm377_vm2 = vmor %vm375_vm1, %vm376_vm15 }
 0x784   :  { %v372_v43 = vsub.f32 1.0, %v371_v42 }
 0x786   :  { %v373_v44 = vmul.f32 %v1457_v41, %v372_v43 }
 0x788   :  { %v374_v45 = vadd.f32 %v1457_v41, %v373_v44 }
 0x78a   :  { %v378_v13 = vsel %vm377_vm2, %v1457_v41, %v374_v45 }
 0x78b   :  { %v383_v50 = vsel %vm380_vm3, %v382_v48, %v378_v13 }
 0x78c   :  { %v389_v53 = vmul.f32 %v387_v52, %v383_v50 }
 0x7e9   :  { %v392_v49 = vpop.permute.xlu0 %391 }
 0x7ea   :  { %v394_v51 = vmul.f32 %v392_v49, %v383_v50 }
 0x7ec   :  { %396 = vrot.lane.b32.xlu1 %v394_v51, %s1665_s3 }
 0x85e   :  { %v397_v54 = vpop.permute.xlu1 %396 }
 0x85f   :  { %v399_v55 = vadd.f32 %v397_v54, %v389_v53 }
 0x861   :  { %1458 = vtanh.f32 %v399_v55  ;;  %v459_v19 = vrot.slane %v399_v55, 6 }
 0x867   :  { %v1459_v56 = vpop.eup %1458 }
 0x868   :  { %402 = vrot.lane.b32.xlu2 %v1459_v56, %s1664_s14 }
 0x8c2   :  { %v403_v57 = vpop.permute.xlu2 %402 }
 0x8c3   :  { %v405_v58 = vmul.f32 %v403_v57, %v383_v50 }
 0x8c5   :  { %v412_v59 = vrot.slane %v405_v58, 6 }
 0x8c7   :  { %413 = vrot.lane.b32.xlu0 %v412_v59, %s1665_s3 }
 0x939   :  { %v414_v60 = vpop.permute.xlu0 %413 }
 0x93a   :  { %1387 = vmatmul.msk.f32.vlgmr.msrb.gmra.mxu2 %vm122_vm6, %v414_v60 }
 0x9bd   :  { %v434_v61 = vpop.f32.mrf.mxu2 }
 0x9be   :  { %v437_v62 = vadd.f32 %v434_v61, %v1759_v11 }
 0x9c0   :  { %1460 = vtanh.f32 %v437_v62  ;;  %v1388_v1 = vmul.f32 -1.442695, %v437_v62 }
 0x9c2   :  { %1462 = vpow2.f32 %v1388_v1 }
 0x9c6   :  { %v1461_v63 = vpop.eup %1460 }
 0x9c7   :  { %463 = vrot.lane.b32.xlu1 %v1461_v63, %s1664_s14 }
 0x9c8   :  { %v1463_v2 = vpop.eup %1462 }
 0x9c9   :  { %v441_v3 = vadd.f32 1.0, %v1463_v2 }
 0x9cb   :  { %1464 = vrcp.f32 %v441_v3  ;;  %v453_v10 = vand.u32 2147483648, %v441_v3  ;;  %vm447_vm7 = vweird.f32 %v441_v3  ;;  %v451_v12 = vand.u32 2147483647, %v441_v3 }
 0x9cd   :  { %v454_v15 = vor.u32 1.1754944e-38, %v453_v10  ;;  %vm452_vm9 = vcmp.eq.f32.partialorder %v451_v12, 8.507059e+37 }
 0x9d1   :  { %v1465_v4 = vpop.eup %1464 }
 0x9d2   :  { %v443_v5 = vmul.f32 %v1465_v4, %v441_v3  ;;  %vm448_vm4 = vweird.f32 %v1465_v4 }
 0x9d3   :  { %vm449_vm8 = vmor %vm447_vm7, %vm448_vm4 }
 0x9d4   :  { %v444_v6 = vsub.f32 1.0, %v443_v5 }
 0x9d6   :  { %v445_v7 = vmul.f32 %v1465_v4, %v444_v6 }
 0x9d8   :  { %v446_v9 = vadd.f32 %v1465_v4, %v445_v7 }
 0x9da   :  { %v450_v14 = vsel %vm449_vm8, %v1465_v4, %v446_v9 }
 0x9db   :  { %v455_v17 = vsel %vm452_vm9, %v454_v15, %v450_v14 }
 0x9dc   :  { %v461_v20 = vmul.f32 %v459_v19, %v455_v17 }
 0xa39   :  { %v464_v16 = vpop.permute.xlu1 %463 }
 0xa3a   :  { %v466_v18 = vmul.f32 %v464_v16, %v455_v17 }
 0xa3c   :  { %468 = vrot.lane.b32.xlu2 %v466_v18, %s1665_s3 }
 0xa44   :  { %257 = vrot.lane.b32.xlu2 %v1774_v0, %s1665_s3 }
 0xa96   :  { %v469_v21 = vpop.permute.xlu2 %468 }
 0xa97   :  { %v1799_v22 = vadd.f32 %v469_v21, %v461_v20 }
 0xa99   :  { %1466 = vtanh.f32 %v1799_v22  ;;  %v530_v16 = vrot.slane %v1799_v22, 6 }
 0xa9e   :  { %v258_v23 = vpop.permute.xlu2 %257 }
 0xa9f   :  { %v1467_v24 = vpop.eup %1466  ;;  %261 = vst.msk [vmem:[#allocation2] sm:$0xc] %vm260_vm10, %v258_v23 }
 0xaa0   :  { %474 = vrot.lane.b32.xlu0 %v1467_v24, %s1664_s14 }
 0xaa8   :  { %332 = vrot.lane.b32.xlu0 %v1783_v31, %s1665_s3  ;;  %v705_v31 = vld [vmem:[#allocation6 + $0x8] sm:$0xff] }
 0xaa9   :  { %736 = vmatpush.msra.mxu2 %v705_v31 }
 0xaab   :  { %737 = vmatpush.msra.mxu2 %v704_v33 }
 0xaad   :  { %1186 = vmatpush.msrb.mxu2 %v1809_v29 }
 0xaaf   :  { %1187 = vmatpush.msrb.mxu2 %v1812_v30 }
 0xab1   :  { %1188 = vmatpush.msrb.mxu2 %v1814_v32 }
 0xab3   :  { %1189 = vmatpush.msrb.mxu2 %v1824_v34 }
 0xb12   :  { %v475_v25 = vpop.permute.xlu0 %474 }
 0xb13   :  { %v477_v26 = vmul.f32 %v475_v25, %v455_v17 }
 0xb15   :  { %479 = vrot.lane.b32.xlu1 %v477_v26, %s1665_s3 }
 0xb1a   :  { %v333_v0 = vpop.permute.xlu0 %332 }
 0xb1b   :  { %336 = vst.msk [vmem:[#allocation2] sm:$0x30] %vm335_vm11, %v333_v0 }
 0xb1d   :  { %407 = vrot.lane.b32.xlu1 %v405_v58, %s1665_s3 }
 0xb87   :  { %v480_v35 = vpop.permute.xlu1 %479 }
 0xb88   :  { %482 = vst.msk [vmem:[#allocation2 + $0x8] sm:$0x3] %vm188_vm5, %v480_v35  ;;  %1389 = vmatmul.msk.f32.vlgmr.msrb.gmra.mxu3 %vm122_vm6, %v480_v35 }
 0xb89   :  { %970 = vmatpush.msrb.mxu3 %v1809_v29 }
 0xb8b   :  { %971 = vmatpush.msrb.mxu3 %v1812_v30 }
 0xb8d   :  { %972 = vmatpush.msrb.mxu3 %v1814_v32 }
 0xb8f   :  { %v408_v36 = vpop.permute.xlu1 %407  ;;  %973 = vmatpush.msrb.mxu3 %v1824_v34 }
 0xb90   :  { %411 = vst.msk [vmem:[#allocation2] sm:$0xc0] %vm410_vm12, %v408_v36  ;;  %761 = vmatmul.f32.vlgmr.msra.gmra.mxu3 %v1663_v8  ;;  %v1851_v8 = vld [vmem:[%s2016_s6] ss:$0 sm:$0xff] }
 0xb91   :  { %1260 = vmatpush.msra.mxu3 %v1809_v29 }
 0xb93   :  { %1261 = vmatpush.msra.mxu3 %v1812_v30 }
 0xb95   :  { %1262 = vmatpush.msra.mxu3 %v1814_v32 }
 0xb97   :  { %v702_v37 = vld [vmem:[#allocation2] sm:$0xff]  ;;  %1263 = vmatpush.msra.mxu3 %v1824_v34 }
 0xb98   :  { %1395 = vmatmul.msk.f32.vlgmr.msra.gmra.mxu2 %vm122_vm6, %v702_v37 }
 0xc0b   :  { %v502_v38 = vpop.f32.mrf.mxu3 }
 0xc0c   :  { %v506_v39 = vrot.slane %v502_v38, 6 }
 0xc0e   :  { %v508_v40 = vadd.f32 %v506_v39, %v1759_v11 }
 0xc10   :  { %1468 = vtanh.f32 %v508_v40  ;;  %v1390_v47 = vmul.f32 -1.442695, %v508_v40 }
 0xc13   :  { %v762_v43 = vpop.f32.mrf.mxu3 }
 0xc16   :  { %v1469_v41 = vpop.eup %1468 }
 0xc17   :  { %534 = vrot.lane.b32.xlu2 %v1469_v41, %s1664_s14 }
 0xc1b   :  { %v739_v42 = vpop.f32.mrf.mxu2 }
 0xc1c   :  { %v1854_v44 = vadd.f32 %v1851_v8, %v739_v42 }
 0xc1e   :  { %v765_v45 = vadd.f32 %v762_v43, %v1854_v44 }
 0xc20   :  { %1470 = vtanh.f32 %v765_v45  ;;  %v1397_v55 = vmul.f32 -1.442695, %v765_v45 }
 0xc21   :  { %1472 = vpow2.f32 %v1390_v47 }
 0xc26   :  { %v1471_v46 = vpop.eup %1470 }
 0xc27   :  { %788 = vrot.lane.b32.xlu0 %v1471_v46, %s1664_s14  ;;  %v1473_v13 = vpop.eup %1472 }
 0xc28   :  { %v512_v48 = vadd.f32 1.0, %v1473_v13 }
 0xc2a   :  { %1474 = vrcp.f32 %v512_v48  ;;  %v524_v54 = vand.u32 2147483648, %v512_v48  ;;  %vm518_vm14 = vweird.f32 %v512_v48  ;;  %v522_v56 = vand.u32 2147483647, %v512_v48 }
 0xc2b   :  { %1476 = vpow2.f32 %v1397_v55 }
 0xc2c   :  { %v525_v58 = vor.u32 1.1754944e-38, %v524_v54  ;;  %vm523_vm1 = vcmp.eq.f32.partialorder %v522_v56, 8.507059e+37 }
 0xc30   :  { %v1475_v49 = vpop.eup %1474 }
 0xc31   :  { %v514_v50 = vmul.f32 %v1475_v49, %v512_v48  ;;  %vm519_vm13 = vweird.f32 %v1475_v49  ;;  %v1477_v62 = vpop.eup %1476 }
 0xc32   :  { %vm520_vm15 = vmor %vm518_vm14, %vm519_vm13  ;;  %v769_v63 = vadd.f32 1.0, %v1477_v62 }
 0xc33   :  { %v515_v51 = vsub.f32 1.0, %v514_v50 }
 0xc34   :  { %1478 = vrcp.f32 %v769_v63  ;;  %v781_v6 = vand.u32 2147483648, %v769_v63  ;;  %vm775_vm3 = vweird.f32 %v769_v63  ;;  %v779_v7 = vand.u32 2147483647, %v769_v63 }
 0xc35   :  { %v516_v52 = vmul.f32 %v1475_v49, %v515_v51 }
 0xc36   :  { %v782_v10 = vor.u32 1.1754944e-38, %v781_v6  ;;  %vm780_vm7 = vcmp.eq.f32.partialorder %v779_v7, 8.507059e+37 }
 0xc37   :  { %v517_v53 = vadd.f32 %v1475_v49, %v516_v52 }
 0xc39   :  { %v521_v57 = vsel %vm520_vm15, %v1475_v49, %v517_v53 }
 0xc3a   :  { %v526_v60 = vsel %vm523_vm1, %v525_v58, %v521_v57  ;;  %v1479_v1 = vpop.eup %1478 }
 0xc3b   :  { %v771_v2 = vmul.f32 %v1479_v1, %v769_v63  ;;  %vm776_vm2 = vweird.f32 %v1479_v1  ;;  %v532_v17 = vmul.f32 %v530_v16, %v526_v60 }
 0xc3c   :  { %vm777_vm4 = vmor %vm775_vm3, %vm776_vm2 }
 0xc3d   :  { %v772_v3 = vsub.f32 1.0, %v771_v2 }
 0xc3f   :  { %v773_v4 = vmul.f32 %v1479_v1, %v772_v3 }
 0xc41   :  { %v774_v5 = vadd.f32 %v1479_v1, %v773_v4 }
 0xc43   :  { %v778_v9 = vsel %vm777_vm4, %v1479_v1, %v774_v5 }
 0xc44   :  { %v783_v14 = vsel %vm780_vm7, %v782_v10, %v778_v9 }
 0xc45   :  { %v786_v21 = vmul.f32 0.0, %v783_v14 }
 0xc71   :  { %v535_v59 = vpop.permute.xlu2 %534 }
 0xc72   :  { %v537_v61 = vmul.f32 %v535_v59, %v526_v60 }
 0xc74   :  { %539 = vrot.lane.b32.xlu1 %v537_v61, %s1665_s3 }
 0xc99   :  { %v789_v12 = vpop.permute.xlu0 %788 }
 0xc9a   :  { %v791_v15 = vmul.f32 %v789_v12, %v783_v14 }
 0xc9c   :  { %793 = vrot.lane.b32.xlu2 %v791_v15, %s1665_s3 }
 0xce6   :  { %v540_v18 = vpop.permute.xlu1 %539 }
 0xce7   :  { %v1861_v19 = vadd.f32 %v540_v18, %v532_v17 }
 0xce9   :  { %1480 = vtanh.f32 %v1861_v19  ;;  %v604_v12 = vrot.slane %v1861_v19, 6 }
 0xcef   :  { %v1481_v20 = vpop.eup %1480 }
 0xcf0   :  { %545 = vrot.lane.b32.xlu0 %v1481_v20, %s1664_s14 }
 0xcf6   :  { %v794_v23 = vpop.permute.xlu2 %793 }
 0xcf7   :  { %v1865_v24 = vadd.f32 %v794_v23, %v786_v21 }
 0xcf9   :  { %1482 = vtanh.f32 %v1865_v24  ;;  %v855_v18 = vrot.slane %v1865_v24, 6 }
 0xcff   :  { %v1483_v25 = vpop.eup %1482 }
 0xd00   :  { %799 = vrot.lane.b32.xlu1 %v1483_v25, %s1664_s14 }
 0xd62   :  { %v546_v26 = vpop.permute.xlu0 %545 }
 0xd63   :  { %v1869_v22 = vmul.f32 %v546_v26, %v526_v60 }
 0xd65   :  { %v554_v0 = vrot.slane %v1869_v22, 2 }
 0xd67   :  { %555 = vrot.lane.b32.xlu2 %v554_v0, %s1665_s3 }
 0xd72   :  { %v800_v27 = vpop.permute.xlu1 %799 }
 0xd73   :  { %v802_v28 = vmul.f32 %v800_v27, %v783_v14 }
 0xd75   :  { %804 = vrot.lane.b32.xlu0 %v802_v28, %s1665_s3 }
 0xdc1   :  { %v556_v31 = vpop.permute.xlu2 %555 }
 0xdc2   :  { %1391 = vmatmul.msk.f32.vlgmr.msrb.gmra.mxu0 %vm122_vm6, %v556_v31 }
 0xdc3   :  { %1044 = vmatpush.msrb.mxu0 %v1809_v29 }
 0xdc5   :  { %1045 = vmatpush.msrb.mxu0 %v1812_v30 }
 0xdc7   :  { %1046 = vmatpush.msrb.mxu0 %v1814_v32 }
 0xdc9   :  { %1047 = vmatpush.msrb.mxu0 %v1824_v34 }
 0xde7   :  { %v805_v33 = vpop.permute.xlu0 %804 }
 0xde8   :  { %807 = vst.msk [vmem:[#allocation2] sm:$0x3] %vm188_vm5, %v805_v33  ;;  %1398 = vmatmul.msk.f32.vlgmr.msra.gmra.mxu0 %vm122_vm6, %v805_v33 }
 0xe3f   :  { %v576_v35 = vpop.f32.mrf.mxu0 }
 0xe40   :  { %v580_v36 = vrot.slane %v576_v35, 4 }
 0xe42   :  { %v582_v37 = vadd.f32 %v580_v36, %v1759_v11 }
 0xe44   :  { %1484 = vtanh.f32 %v582_v37  ;;  %v1392_v43 = vmul.f32 -1.442695, %v582_v37 }
 0xe4a   :  { %v1485_v38 = vpop.eup %1484 }
 0xe4b   :  { %608 = vrot.lane.b32.xlu1 %v1485_v38, %s1664_s14 }
 0xe65   :  { %v827_v39 = vpop.f32.mrf.mxu0 }
 0xe66   :  { %v831_v40 = vrot.slane %v827_v39, 6 }
 0xe68   :  { %v833_v41 = vadd.f32 %v831_v40, %v1854_v44 }
 0xe6a   :  { %1486 = vtanh.f32 %v833_v41  ;;  %v1399_v47 = vmul.f32 -1.442695, %v833_v41 }
 0xe6b   :  { %1488 = vpow2.f32 %v1392_v43 }
 0xe70   :  { %v1487_v42 = vpop.eup %1486 }
 0xe71   :  { %859 = vrot.lane.b32.xlu2 %v1487_v42, %s1664_s14  ;;  %v1489_v45 = vpop.eup %1488 }
 0xe72   :  { %v586_v46 = vadd.f32 1.0, %v1489_v45 }
 0xe74   :  { %1490 = vrcp.f32 %v586_v46  ;;  %v598_v55 = vand.u32 2147483648, %v586_v46  ;;  %vm592_vm9 = vweird.f32 %v586_v46  ;;  %v596_v56 = vand.u32 2147483647, %v586_v46 }
 0xe75   :  { %1492 = vpow2.f32 %v1399_v47 }
 0xe76   :  { %v599_v59 = vor.u32 1.1754944e-38, %v598_v55  ;;  %vm597_vm14 = vcmp.eq.f32.partialorder %v596_v56, 8.507059e+37 }
 0xe7a   :  { %v1491_v13 = vpop.eup %1490 }
 0xe7b   :  { %v1493_v48 = vpop.eup %1492  ;;  %v588_v49 = vmul.f32 %v1491_v13, %v586_v46  ;;  %vm593_vm8 = vweird.f32 %v1491_v13 }
 0xe7c   :  { %v837_v50 = vadd.f32 1.0, %v1493_v48  ;;  %vm594_vm13 = vmor %vm592_vm9, %vm593_vm8 }
 0xe7d   :  { %v589_v51 = vsub.f32 1.0, %v588_v49 }
 0xe7e   :  { %1494 = vrcp.f32 %v837_v50  ;;  %v849_v3 = vand.u32 2147483648, %v837_v50  ;;  %vm843_vm1 = vweird.f32 %v837_v50  ;;  %v847_v4 = vand.u32 2147483647, %v837_v50 }
 0xe7f   :  { %v590_v52 = vmul.f32 %v1491_v13, %v589_v51 }
 0xe80   :  { %v850_v6 = vor.u32 1.1754944e-38, %v849_v3  ;;  %vm848_vm3 = vcmp.eq.f32.partialorder %v847_v4, 8.507059e+37 }
 0xe81   :  { %v591_v54 = vadd.f32 %v1491_v13, %v590_v52 }
 0xe83   :  { %v595_v58 = vsel %vm594_vm13, %v1491_v13, %v591_v54 }
 0xe84   :  { %v1495_v53 = vpop.eup %1494  ;;  %v600_v61 = vsel %vm597_vm14, %v599_v59, %v595_v58 }
 0xe85   :  { %v839_v57 = vmul.f32 %v1495_v53, %v837_v50  ;;  %vm844_vm15 = vweird.f32 %v1495_v53  ;;  %v606_v14 = vmul.f32 %v604_v12, %v600_v61 }
 0xe86   :  { %vm845_vm2 = vmor %vm843_vm1, %vm844_vm15 }
 0xe87   :  { %v840_v60 = vsub.f32 1.0, %v839_v57 }
 0xe89   :  { %v841_v1 = vmul.f32 %v1495_v53, %v840_v60 }
 0xe8b   :  { %v842_v2 = vadd.f32 %v1495_v53, %v841_v1 }
 0xe8d   :  { %v846_v5 = vsel %vm845_vm2, %v1495_v53, %v842_v2 }
 0xe8e   :  { %v851_v9 = vsel %vm848_vm3, %v850_v6, %v846_v5 }
 0xe8f   :  { %v857_v20 = vmul.f32 %v855_v18, %v851_v9 }
 0xebd   :  { %v609_v62 = vpop.permute.xlu1 %608 }
 0xebe   :  { %v611_v63 = vmul.f32 %v609_v62, %v600_v61 }
 0xec0   :  { %613 = vrot.lane.b32.xlu0 %v611_v63, %s1665_s3 }
 0xecb   :  { %v860_v7 = vpop.permute.xlu2 %859 }
 0xecc   :  { %v862_v10 = vmul.f32 %v860_v7, %v851_v9 }
 0xece   :  { %864 = vrot.lane.b32.xlu1 %v862_v10, %s1665_s3 }
 0xf32   :  { %v614_v15 = vpop.permute.xlu0 %613 }
 0xf33   :  { %v1888_v16 = vadd.f32 %v614_v15, %v606_v14 }
 0xf35   :  { %1496 = vtanh.f32 %v1888_v16 }
 0xf3b   :  { %v1497_v17 = vpop.eup %1496 }
 0xf3c   :  { %619 = vrot.lane.b32.xlu2 %v1497_v17, %s1664_s14 }
 0xf40   :  { %v865_v21 = vpop.permute.xlu1 %864 }
 0xf41   :  { %v867_v23 = vadd.f32 %v865_v21, %v857_v20 }
 0xf43   :  { %1498 = vtanh.f32 %v867_v23  ;;  %v929_v54 = vrot.slane %v867_v23, 6  ;;  %v678_v23 = vrot.slane %v1888_v16, 6 }
 0xf49   :  { %v1499_v25 = vpop.eup %1498 }
 0xf4a   :  { %870 = vrot.lane.b32.xlu0 %v1499_v25, %s1664_s14 }
 0xf96   :  { %v620_v26 = vpop.permute.xlu2 %619 }
 0xf97   :  { %v1894_v19 = vmul.f32 %v620_v26, %v600_v61 }
 0xf99   :  { %v628_v0 = vrot.slane %v1894_v19, 4 }
 0xf9b   :  { %629 = vrot.lane.b32.xlu1 %v628_v0, %s1665_s3 }
 0xfbc   :  { %v871_v27 = vpop.permute.xlu0 %870 }
 0xfbd   :  { %v1898_v28 = vmul.f32 %v871_v27, %v851_v9 }
 0xfbf   :  { %v879_v31 = vrot.slane %v1898_v28, 2 }
 0xfc1   :  { %880 = vrot.lane.b32.xlu2 %v879_v31, %s1665_s3 }
0x100d   :  { %v630_v24 = vpop.permute.xlu1 %629 }
0x100e   :  { %1393 = vmatmul.msk.f32.vlgmr.msrb.gmra.mxu1 %vm122_vm6, %v630_v24 }
0x100f   :  { %1112 = vmatpush.msrb.mxu1 %v1809_v29 }
0x1011   :  { %1113 = vmatpush.msrb.mxu1 %v1812_v30 }
0x1013   :  { %1114 = vmatpush.msrb.mxu1 %v1814_v32 }
0x1015   :  { %1115 = vmatpush.msrb.mxu1 %v1824_v34 }
0x101b   :  { %v881_v33 = vpop.permute.xlu2 %880 }
0x101c   :  { %1400 = vmatmul.msk.f32.vlgmr.msra.gmra.mxu1 %vm122_vm6, %v881_v33 }
0x108b   :  { %v650_v35 = vpop.f32.mrf.mxu1 }
0x108c   :  { %v654_v47 = vrot.slane %v650_v35, 2 }
0x108e   :  { %v656_v49 = vadd.f32 %v654_v47, %v1759_v11 }
0x1090   :  { %v1394_v11 = vmul.f32 -1.442695, %v656_v49 }
0x1099   :  { %v901_v36 = vpop.f32.mrf.mxu1 }
0x109a   :  { %v905_v37 = vrot.slane %v901_v36, 4 }
0x109c   :  { %v907_v38 = vadd.f32 %v905_v37, %v1854_v44 }
0x109e   :  { %1500 = vtanh.f32 %v907_v38  ;;  %v1401_v40 = vmul.f32 -1.442695, %v907_v38 }
0x10a0   :  { %1502 = vpow2.f32 %v1401_v40 }
0x10a4   :  { %v1501_v39 = vpop.eup %1500 }
0x10a5   :  { %933 = vrot.lane.b32.xlu0 %v1501_v39, %s1664_s14 }
0x10a6   :  { %v1503_v29 = vpop.eup %1502 }
0x10a7   :  { %v911_v30 = vadd.f32 1.0, %v1503_v29 }
0x10a9   :  { %1504 = vrcp.f32 %v911_v30  ;;  %v923_v45 = vand.u32 2147483648, %v911_v30  ;;  %vm917_vm7 = vweird.f32 %v911_v30  ;;  %v921_v46 = vand.u32 2147483647, %v911_v30 }
0x10aa   :  { %1506 = vtanh.f32 %v656_v49 }
0x10ab   :  { %v924_v48 = vor.u32 1.1754944e-38, %v923_v45  ;;  %vm922_vm9 = vcmp.eq.f32.partialorder %v921_v46, 8.507059e+37 }
0x10af   :  { %v1505_v32 = vpop.eup %1504 }
0x10b0   :  { %v913_v41 = vmul.f32 %v1505_v32, %v911_v30  ;;  %vm918_vm4 = vweird.f32 %v1505_v32  ;;  %v1507_v53 = vpop.eup %1506 }
0x10b1   :  { %vm919_vm8 = vmor %vm917_vm7, %vm918_vm4 }
0x10b2   :  { %v914_v34 = vsub.f32 1.0, %v913_v41 }
0x10b4   :  { %v915_v42 = vmul.f32 %v1505_v32, %v914_v34 }
0x10b6   :  { %v916_v43 = vadd.f32 %v1505_v32, %v915_v42 }
0x10b8   :  { %v920_v13 = vsel %vm919_vm8, %v1505_v32, %v916_v43 }
0x10b9   :  { %v925_v51 = vsel %vm922_vm9, %v924_v48, %v920_v13 }
0x10ba   :  { %v931_v55 = vmul.f32 %v929_v54, %v925_v51 }
0x1117   :  { %v934_v50 = vpop.permute.xlu0 %933 }
0x1118   :  { %v936_v52 = vmul.f32 %v934_v50, %v925_v51 }
0x111a   :  { %938 = vrot.lane.b32.xlu1 %v936_v52, %s1665_s3 }
0x1122   :  { %682 = vrot.lane.b32.xlu1 %v1507_v53, %s1664_s14 }
0x118c   :  { %v939_v56 = vpop.permute.xlu1 %938 }
0x118d   :  { %v1913_v57 = vadd.f32 %v939_v56, %v931_v55 }
0x118f   :  { %1508 = vtanh.f32 %v1913_v57  ;;  %v1003_v43 = vrot.slane %v1913_v57, 6 }
0x1190   :  { %1510 = vpow2.f32 %v1394_v11 }
0x1194   :  { %v683_v10 = vpop.permute.xlu1 %682 }
0x1195   :  { %v1509_v58 = vpop.eup %1508 }
0x1196   :  { %944 = vrot.lane.b32.xlu2 %v1509_v58, %s1664_s14  ;;  %v1511_v59 = vpop.eup %1510 }
0x1197   :  { %v660_v60 = vadd.f32 1.0, %v1511_v59 }
0x1199   :  { %1512 = vrcp.f32 %v660_v60  ;;  %v672_v6 = vand.u32 2147483648, %v660_v60  ;;  %vm666_vm14 = vweird.f32 %v660_v60  ;;  %v670_v7 = vand.u32 2147483647, %v660_v60 }
0x119b   :  { %v673_v12 = vor.u32 1.1754944e-38, %v672_v6  ;;  %vm671_vm1 = vcmp.eq.f32.partialorder %v670_v7, 8.507059e+37 }
0x119f   :  { %v1513_v61 = vpop.eup %1512 }
0x11a0   :  { %v662_v62 = vmul.f32 %v1513_v61, %v660_v60  ;;  %vm667_vm13 = vweird.f32 %v1513_v61 }
0x11a1   :  { %vm668_vm15 = vmor %vm666_vm14, %vm667_vm13 }
0x11a2   :  { %v663_v63 = vsub.f32 1.0, %v662_v62 }
0x11a4   :  { %v664_v1 = vmul.f32 %v1513_v61, %v663_v63 }
0x11a6   :  { %v665_v4 = vadd.f32 %v1513_v61, %v664_v1 }
0x11a8   :  { %v669_v9 = vsel %vm668_vm15, %v1513_v61, %v665_v4 }
0x11a9   :  { %v674_v14 = vsel %vm671_vm1, %v673_v12, %v669_v9 }
0x11aa   :  { %v685_v15 = vmul.f32 %v683_v10, %v674_v14  ;;  %v680_v26 = vmul.f32 %v678_v23, %v674_v14 }
0x11f0   :  { %v945_v2 = vpop.permute.xlu2 %944 }
0x11f1   :  { %v1917_v3 = vmul.f32 %v945_v2, %v925_v51 }
0x11f3   :  { %v953_v5 = vrot.slane %v1917_v3, 4 }
0x11f5   :  { %954 = vrot.lane.b32.xlu0 %v953_v5, %s1665_s3 }
0x11fd   :  { %687 = vrot.lane.b32.xlu0 %v685_v15, %s1665_s3 }
0x1267   :  { %v955_v17 = vpop.permute.xlu0 %954 }
0x1268   :  { %1402 = vmatmul.msk.f32.vlgmr.msrb.gmra.mxu3 %vm122_vm6, %v955_v17 }
0x126f   :  { %v688_v25 = vpop.permute.xlu0 %687 }
0x1270   :  { %v690_v0 = vadd.f32 %v688_v25, %v680_v26 }
0x12eb   :  { %v975_v18 = vpop.f32.mrf.mxu3 }
0x12ec   :  { %v979_v20 = vrot.slane %v975_v18, 2 }
0x12ee   :  { %v981_v21 = vadd.f32 %v979_v20, %v1854_v44 }
0x12f0   :  { %1514 = vtanh.f32 %v981_v21  ;;  %v1403_v24 = vmul.f32 -1.442695, %v981_v21 }
0x12f1   :  { %1516 = vtanh.f32 %v690_v0 }
0x12f2   :  { %1518 = vpow2.f32 %v1403_v24 }
0x12f6   :  { %v1515_v27 = vpop.eup %1514 }
0x12f7   :  { %1007 = vrot.lane.b32.xlu2 %v1515_v27, %s1664_s14  ;;  %v1517_v31 = vpop.eup %1516 }
0x12f8   :  { %v1519_v33 = vpop.eup %1518 }
0x12f9   :  { %v985_v44 = vadd.f32 1.0, %v1519_v33 }
0x12fb   :  { %1520 = vrcp.f32 %v985_v44  ;;  %v997_v39 = vand.u32 2147483648, %v985_v44  ;;  %vm991_vm3 = vweird.f32 %v985_v44  ;;  %v995_v40 = vand.u32 2147483647, %v985_v44 }
0x12fd   :  { %v998_v30 = vor.u32 1.1754944e-38, %v997_v39  ;;  %vm996_vm7 = vcmp.eq.f32.partialorder %v995_v40, 8.507059e+37 }
0x12ff   :  { %693 = vrot.lane.b32.xlu2 %v1517_v31, %s1664_s14 }
0x1301   :  { %v1521_v16 = vpop.eup %1520 }
0x1302   :  { %v987_v35 = vmul.f32 %v1521_v16, %v985_v44  ;;  %vm992_vm2 = vweird.f32 %v1521_v16 }
0x1303   :  { %vm993_vm4 = vmor %vm991_vm3, %vm992_vm2 }
0x1304   :  { %v988_v36 = vsub.f32 1.0, %v987_v35 }
0x1306   :  { %v989_v37 = vmul.f32 %v1521_v16, %v988_v36 }
0x1307   :  { %624 = vrot.lane.b32.xlu2 %v1894_v19, %s1665_s3 }
0x1308   :  { %v990_v38 = vadd.f32 %v1521_v16, %v989_v37 }
0x130a   :  { %v994_v29 = vsel %vm993_vm4, %v1521_v16, %v990_v38 }
0x130b   :  { %v999_v19 = vsel %vm996_vm7, %v998_v30, %v994_v29 }
0x130c   :  { %v1005_v45 = vmul.f32 %v1003_v43, %v999_v19 }
0x1351   :  { %v1008_v32 = vpop.permute.xlu2 %1007 }
0x1352   :  { %v1010_v41 = vmul.f32 %v1008_v32, %v999_v19 }
0x1354   :  { %1012 = vrot.lane.b32.xlu1 %v1010_v41, %s1665_s3 }
0x1359   :  { %v694_v34 = vpop.permute.xlu2 %693 }
0x135a   :  { %v696_v49 = vmul.f32 %v694_v34, %v674_v14 }
0x135c   :  { %550 = vrot.lane.b32.xlu1 %v1869_v22, %s1665_s3 }
0x1361   :  { %v625_v42 = vpop.permute.xlu2 %624 }
0x1362   :  { %627 = vst.msk [vmem:[#allocation2 + $0x8] sm:$0x30] %vm335_vm11, %v625_v42 }
0x13c6   :  { %v1013_v46 = vpop.permute.xlu1 %1012 }
0x13c7   :  { %v1015_v47 = vadd.f32 %v1013_v46, %v1005_v45 }
0x13c9   :  { %1522 = vtanh.f32 %v1015_v47  ;;  %v1074_v14 = vrot.slane %v1015_v47, 6 }
0x13ce   :  { %v551_v13 = vpop.permute.xlu1 %550 }
0x13cf   :  { %v1523_v48 = vpop.eup %1522  ;;  %553 = vst.msk [vmem:[#allocation2 + $0x8] sm:$0xc] %vm260_vm10, %v551_v13 }
0x13d0   :  { %1018 = vrot.lane.b32.xlu0 %v1523_v48, %s1664_s14 }
0x13d8   :  { %698 = vrot.lane.b32.xlu0 %v696_v49, %s1665_s3 }
0x1442   :  { %v1019_v50 = vpop.permute.xlu0 %1018 }
0x1443   :  { %v1937_v22 = vmul.f32 %v1019_v50, %v999_v19 }
0x1445   :  { %v1027_v51 = vrot.slane %v1937_v22, 6 }
0x1447   :  { %1028 = vrot.lane.b32.xlu1 %v1027_v51, %s1665_s3 }
0x144a   :  { %v699_v52 = vpop.permute.xlu0 %698 }
0x144b   :  { %701 = vst.msk [vmem:[#allocation2 + $0x8] sm:$0xc0] %vm410_vm12, %v699_v52 }
0x1452   :  { %v703_v53 = vld [vmem:[#allocation2 + $0x8] sm:$0xff] }
0x1453   :  { %1396 = vmatmul.msk.f32.gmra.mxu2 %vm122_vm6, %v703_v53 }
0x14b9   :  { %v1029_v54 = vpop.permute.xlu1 %1028 }
0x14ba   :  { %1404 = vmatmul.msk.f32.vlgmr.msrb.gmra.mxu0 %vm122_vm6, %v1029_v54 }
0x14d6   :  { %v742_v55 = vpop.f32.mrf.mxu2 }
0x14d7   :  { %v1945_v56 = vadd.f32 %v1851_v8, %v742_v55 }
0x1537   :  { %v1049_v57 = vpop.f32.mrf.mxu0 }
0x1538   :  { %v1052_v58 = vadd.f32 %v1049_v57, %v1945_v56 }
0x153a   :  { %1524 = vtanh.f32 %v1052_v58  ;;  %v1405_v59 = vmul.f32 -1.442695, %v1052_v58 }
0x153c   :  { %1526 = vpow2.f32 %v1405_v59 }
0x1540   :  { %v1525_v11 = vpop.eup %1524 }
0x1541   :  { %1078 = vrot.lane.b32.xlu2 %v1525_v11, %s1664_s14 }
0x1542   :  { %v1527_v60 = vpop.eup %1526 }
0x1543   :  { %v1056_v61 = vadd.f32 1.0, %v1527_v60 }
0x1545   :  { %1528 = vrcp.f32 %v1056_v61  ;;  %v1068_v8 = vand.u32 2147483648, %v1056_v61  ;;  %vm1062_vm9 = vweird.f32 %v1056_v61  ;;  %v1066_v5 = vand.u32 2147483647, %v1056_v61 }
0x1547   :  { %v1069_v7 = vor.u32 1.1754944e-38, %v1068_v8  ;;  %vm1067_vm14 = vcmp.eq.f32.partialorder %v1066_v5, 8.507059e+37 }
0x154b   :  { %v1529_v62 = vpop.eup %1528 }
0x154c   :  { %v1058_v63 = vmul.f32 %v1529_v62, %v1056_v61  ;;  %vm1063_vm8 = vweird.f32 %v1529_v62 }
0x154d   :  { %vm1064_vm13 = vmor %vm1062_vm9, %vm1063_vm8 }
0x154e   :  { %v1059_v1 = vsub.f32 1.0, %v1058_v63 }
0x1550   :  { %v1060_v2 = vmul.f32 %v1529_v62, %v1059_v1 }
0x1552   :  { %v1061_v4 = vadd.f32 %v1529_v62, %v1060_v2 }
0x1554   :  { %v1065_v6 = vsel %vm1064_vm13, %v1529_v62, %v1061_v4 }
0x1555   :  { %v1070_v10 = vsel %vm1067_vm14, %v1069_v7, %v1065_v6 }
0x1556   :  { %v1076_v15 = vmul.f32 %v1074_v14, %v1070_v10 }
0x159b   :  { %v1079_v9 = vpop.permute.xlu2 %1078 }
0x159c   :  { %v1081_v12 = vmul.f32 %v1079_v9, %v1070_v10 }
0x159e   :  { %1083 = vrot.lane.b32.xlu0 %v1081_v12, %s1665_s3 }
0x1610   :  { %v1084_v17 = vpop.permute.xlu0 %1083 }
0x1611   :  { %v1086_v18 = vadd.f32 %v1084_v17, %v1076_v15 }
0x1613   :  { %1530 = vtanh.f32 %v1086_v18  ;;  %v1145_v34 = vrot.slane %v1086_v18, 6 }
0x1619   :  { %v1531_v20 = vpop.eup %1530 }
0x161a   :  { %1089 = vrot.lane.b32.xlu1 %v1531_v20, %s1664_s14 }
0x168c   :  { %v1090_v21 = vpop.permute.xlu1 %1089 }
0x168d   :  { %v1092_v23 = vmul.f32 %v1090_v21, %v1070_v10 }
0x168f   :  { %1094 = vrot.lane.b32.xlu2 %v1092_v23, %s1665_s3 }
0x16e9   :  { %v1095_v25 = vpop.permute.xlu2 %1094 }
0x16ea   :  { %1097 = vst.msk [vmem:[#allocation2 + $0x8] sm:$0x3] %vm188_vm5, %v1095_v25  ;;  %1406 = vmatmul.msk.f32.vlgmr.msrb.gmra.mxu1 %vm122_vm6, %v1095_v25 }
0x1767   :  { %v1117_v26 = vpop.f32.mrf.mxu1 }
0x1768   :  { %v1121_v0 = vrot.slane %v1117_v26, 6 }
0x176a   :  { %v1123_v27 = vadd.f32 %v1121_v0, %v1945_v56 }
0x176c   :  { %1532 = vtanh.f32 %v1123_v27  ;;  %v1407_v24 = vmul.f32 -1.442695, %v1123_v27 }
0x176e   :  { %1534 = vpow2.f32 %v1407_v24 }
0x1772   :  { %v1533_v31 = vpop.eup %1532 }
0x1773   :  { %1149 = vrot.lane.b32.xlu0 %v1533_v31, %s1664_s14 }
0x1774   :  { %v1535_v33 = vpop.eup %1534 }
0x1775   :  { %v1127_v44 = vadd.f32 1.0, %v1535_v33 }
0x1777   :  { %1536 = vrcp.f32 %v1127_v44  ;;  %v1139_v39 = vand.u32 2147483648, %v1127_v44  ;;  %vm1133_vm15 = vweird.f32 %v1127_v44  ;;  %v1137_v40 = vand.u32 2147483647, %v1127_v44 }
0x1779   :  { %v1140_v30 = vor.u32 1.1754944e-38, %v1139_v39  ;;  %vm1138_vm2 = vcmp.eq.f32.partialorder %v1137_v40, 8.507059e+37 }
0x177d   :  { %v1537_v16 = vpop.eup %1536 }
0x177e   :  { %v1129_v35 = vmul.f32 %v1537_v16, %v1127_v44  ;;  %vm1134_vm5 = vweird.f32 %v1537_v16 }
0x177f   :  { %vm1135_vm1 = vmor %vm1133_vm15, %vm1134_vm5 }
0x1780   :  { %v1130_v36 = vsub.f32 1.0, %v1129_v35 }
0x1782   :  { %v1131_v37 = vmul.f32 %v1537_v16, %v1130_v36 }
0x1784   :  { %v1132_v38 = vadd.f32 %v1537_v16, %v1131_v37 }
0x1786   :  { %v1136_v29 = vsel %vm1135_vm1, %v1537_v16, %v1132_v38 }
0x1787   :  { %v1141_v19 = vsel %vm1138_vm2, %v1140_v30, %v1136_v29 }
0x1788   :  { %v1147_v42 = vmul.f32 %v1145_v34, %v1141_v19 }
0x17e5   :  { %v1150_v32 = vpop.permute.xlu0 %1149 }
0x17e6   :  { %v1152_v41 = vmul.f32 %v1150_v32, %v1141_v19 }
0x17e8   :  { %1154 = vrot.lane.b32.xlu1 %v1152_v41, %s1665_s3 }
0x185a   :  { %v1155_v43 = vpop.permute.xlu1 %1154 }
0x185b   :  { %v1157_v45 = vadd.f32 %v1155_v43, %v1147_v42 }
0x185d   :  { %1538 = vtanh.f32 %v1157_v45  ;;  %v1219_v6 = vrot.slane %v1157_v45, 6  ;;  %v1321_v45 = vld [vmem:[%s2017_s7 + $0x10] sm:$0xff] }
0x1863   :  { %v1539_v46 = vpop.eup %1538 }
0x1864   :  { %1160 = vrot.lane.b32.xlu2 %v1539_v46, %s1664_s14  ;;  %v1320_v46 = vld [vmem:[%s2017_s7 + $0x8] sm:$0xff] }
0x18be   :  { %v1161_v47 = vpop.permute.xlu2 %1160 }
0x18bf   :  { %v1163_v13 = vmul.f32 %v1161_v47, %v1141_v19  ;;  %v1319_v47 = vld [vmem:[%s2017_s7] sm:$0xff] }
0x18c1   :  { %v1169_v48 = vrot.slane %v1163_v13, 2 }
0x18c3   :  { %1170 = vrot.lane.b32.xlu0 %v1169_v48, %s1665_s3 }
0x1935   :  { %v1171_v49 = vpop.permute.xlu0 %1170 }
0x1936   :  { %1408 = vmatmul.msk.f32.vlgmr.msrb.gmra.mxu2 %vm122_vm6, %v1171_v49 }
0x19b9   :  { %v1191_v50 = vpop.f32.mrf.mxu2 }
0x19ba   :  { %v1195_v51 = vrot.slane %v1191_v50, 4 }
0x19bc   :  { %v1197_v52 = vadd.f32 %v1195_v51, %v1945_v56 }
0x19be   :  { %1540 = vtanh.f32 %v1197_v52  ;;  %v1409_v54 = vmul.f32 -1.442695, %v1197_v52  ;;  %v1427_v52 = vld [vmem:[%s2018_s8] ss:$0 sm:$0xff] }
0x19c0   :  { %1542 = vpow2.f32 %v1409_v54 }
0x19c4   :  { %v1541_v53 = vpop.eup %1540 }
0x19c5   :  { %1223 = vrot.lane.b32.xlu1 %v1541_v53, %s1664_s14 }
0x19c6   :  { %v1543_v55 = vpop.eup %1542 }
0x19c7   :  { %v1201_v57 = vadd.f32 1.0, %v1543_v55 }
0x19c9   :  { %1544 = vrcp.f32 %v1201_v57  ;;  %v1213_v62 = vand.u32 2147483648, %v1201_v57  ;;  %vm1207_vm4 = vweird.f32 %v1201_v57  ;;  %v1211_v63 = vand.u32 2147483647, %v1201_v57 }
0x19cb   :  { %v1214_v2 = vor.u32 1.1754944e-38, %v1213_v62  ;;  %vm1212_vm8 = vcmp.eq.f32.partialorder %v1211_v63, 8.507059e+37 }
0x19cf   :  { %v1545_v58 = vpop.eup %1544 }
0x19d0   :  { %v1203_v11 = vmul.f32 %v1545_v58, %v1201_v57  ;;  %vm1208_vm3 = vweird.f32 %v1545_v58 }
0x19d1   :  { %vm1209_vm7 = vmor %vm1207_vm4, %vm1208_vm3 }
0x19d2   :  { %v1204_v59 = vsub.f32 1.0, %v1203_v11 }
0x19d4   :  { %v1205_v60 = vmul.f32 %v1545_v58, %v1204_v59 }
0x19d6   :  { %v1206_v61 = vadd.f32 %v1545_v58, %v1205_v60 }
0x19d8   :  { %v1210_v1 = vsel %vm1209_vm7, %v1545_v58, %v1206_v61 }
0x19d9   :  { %v1215_v8 = vsel %vm1212_vm8, %v1214_v2, %v1210_v1 }
0x19da   :  { %v1221_v7 = vmul.f32 %v1219_v6, %v1215_v8 }
0x1a37   :  { %v1224_v4 = vpop.permute.xlu1 %1223 }
0x1a38   :  { %v1226_v5 = vmul.f32 %v1224_v4, %v1215_v8 }
0x1a3a   :  { %1228 = vrot.lane.b32.xlu2 %v1226_v5, %s1665_s3 }
0x1a94   :  { %v1229_v9 = vpop.permute.xlu2 %1228 }
0x1a95   :  { %v1231_v10 = vadd.f32 %v1229_v9, %v1221_v7 }
0x1a97   :  { %1546 = vtanh.f32 %v1231_v10  ;;  %v1293_v30 = vrot.slane %v1231_v10, 6 }
0x1a9d   :  { %v1547_v12 = vpop.eup %1546 }
0x1a9e   :  { %1234 = vrot.lane.b32.xlu0 %v1547_v12, %s1664_s14 }
0x1b10   :  { %v1235_v14 = vpop.permute.xlu0 %1234 }
0x1b11   :  { %v1237_v15 = vmul.f32 %v1235_v14, %v1215_v8 }
0x1b13   :  { %v1243_v17 = vrot.slane %v1237_v15, 4 }
0x1b15   :  { %1244 = vrot.lane.b32.xlu1 %v1243_v17, %s1665_s3 }
0x1b87   :  { %v1245_v18 = vpop.permute.xlu1 %1244 }
0x1b88   :  { %1410 = vmatmul.msk.f32.vlgmr.msra.gmra.mxu3 %vm122_vm6, %v1245_v18 }
0x1c0b   :  { %v1265_v20 = vpop.f32.mrf.mxu3 }
0x1c0c   :  { %v1269_v21 = vrot.slane %v1265_v20, 2 }
0x1c0e   :  { %v1271_v23 = vadd.f32 %v1269_v21, %v1945_v56 }
0x1c10   :  { %1548 = vtanh.f32 %v1271_v23  ;;  %v1411_v26 = vmul.f32 -1.442695, %v1271_v23 }
0x1c12   :  { %1550 = vpow2.f32 %v1411_v26 }
0x1c16   :  { %v1549_v25 = vpop.eup %1548 }
0x1c17   :  { %1297 = vrot.lane.b32.xlu2 %v1549_v25, %s1664_s14 }
0x1c18   :  { %v1551_v0 = vpop.eup %1550 }
0x1c19   :  { %v1275_v27 = vadd.f32 1.0, %v1551_v0 }
0x1c1b   :  { %1552 = vrcp.f32 %v1275_v27  ;;  %v1287_v56 = vand.u32 2147483648, %v1275_v27  ;;  %vm1281_vm13 = vweird.f32 %v1275_v27  ;;  %v1285_v35 = vand.u32 2147483647, %v1275_v27 }
0x1c1d   :  { %v1288_v37 = vor.u32 1.1754944e-38, %v1287_v56  ;;  %vm1286_vm5 = vcmp.eq.f32.partialorder %v1285_v35, 8.507059e+37 }
0x1c1f   :  { %875 = vrot.lane.b32.xlu2 %v1898_v28, %s1665_s3 }
0x1c21   :  { %v1553_v31 = vpop.eup %1552 }
0x1c22   :  { %v1277_v24 = vmul.f32 %v1553_v31, %v1275_v27  ;;  %vm1282_vm9 = vweird.f32 %v1553_v31 }
0x1c23   :  { %vm1283_vm14 = vmor %vm1281_vm13, %vm1282_vm9 }
0x1c24   :  { %v1278_v33 = vsub.f32 1.0, %v1277_v24 }
0x1c26   :  { %v1279_v44 = vmul.f32 %v1553_v31, %v1278_v33 }
0x1c27   :  { %1165 = vrot.lane.b32.xlu2 %v1163_v13, %s1665_s3 }
0x1c28   :  { %v1280_v16 = vadd.f32 %v1553_v31, %v1279_v44 }
0x1c2a   :  { %v1284_v36 = vsel %vm1283_vm14, %v1553_v31, %v1280_v16 }
0x1c2b   :  { %v1289_v38 = vsel %vm1286_vm5, %v1288_v37, %v1284_v36 }
0x1c2c   :  { %v1295_v32 = vmul.f32 %v1293_v30, %v1289_v38 }
0x1c71   :  { %v1298_v28 = vpop.permute.xlu2 %1297 }
0x1c72   :  { %v1300_v39 = vmul.f32 %v1298_v28, %v1289_v38 }
0x1c74   :  { %1302 = vrot.lane.b32.xlu0 %v1300_v39, %s1665_s3 }
0x1c79   :  { %v876_v40 = vpop.permute.xlu2 %875 }
0x1c7a   :  { %878 = vst.msk [vmem:[#allocation2] sm:$0xc] %vm260_vm10, %v876_v40 }
0x1c7c   :  { %949 = vrot.lane.b32.xlu0 %v1917_v3, %s1665_s3  ;;  %v1322_v3 = vld [vmem:[%s2017_s7 + $0x18] sm:$0xff] }
0x1c7d   :  { %1345 = vmatpush.msra.mxu0 %v1322_v3 }
0x1c7f   :  { %1346 = vmatpush.msra.mxu0 %v1321_v45 }
0x1c81   :  { %v1166_v29 = vpop.permute.xlu2 %1165  ;;  %1347 = vmatpush.msra.mxu0 %v1320_v46 }
0x1c82   :  { %1168 = vst.msk [vmem:[#allocation2 + $0x8] sm:$0xc] %vm260_vm10, %v1166_v29 }
0x1c83   :  { %1348 = vmatpush.msra.mxu0 %v1319_v47 }
0x1c84   :  { %1239 = vrot.lane.b32.xlu0 %v1237_v15, %s1665_s3 }
0x1ce6   :  { %v1303_v19 = vpop.permute.xlu0 %1302 }
0x1ce7   :  { %v1305_v41 = vadd.f32 %v1303_v19, %v1295_v32 }
0x1ce9   :  { %1554 = vtanh.f32 %v1305_v41 }
0x1cee   :  { %v950_v34 = vpop.permute.xlu0 %949 }
0x1cef   :  { %v1555_v42 = vpop.eup %1554  ;;  %952 = vst.msk [vmem:[#allocation2] sm:$0x30] %vm335_vm11, %v950_v34 }
0x1cf0   :  { %1308 = vrot.lane.b32.xlu1 %v1555_v42, %s1664_s14 }
0x1cf6   :  { %v1240_v43 = vpop.permute.xlu0 %1239 }
0x1cf7   :  { %1242 = vst.msk [vmem:[#allocation2 + $0x8] sm:$0x30] %vm335_vm11, %v1240_v43 }
0x1cf8   :  { %1023 = vrot.lane.b32.xlu1 %v1937_v22, %s1665_s3 }
0x1d62   :  { %v1309_v22 = vpop.permute.xlu1 %1308 }
0x1d63   :  { %v1311_v13 = vmul.f32 %v1309_v22, %v1289_v38 }
0x1d65   :  { %1313 = vrot.lane.b32.xlu1 %v1311_v13, %s1665_s3 }
0x1d6a   :  { %v1024_v48 = vpop.permute.xlu1 %1023 }
0x1d6b   :  { %1026 = vst.msk [vmem:[#allocation2] sm:$0xc0] %vm410_vm12, %v1024_v48 }
0x1d72   :  { %v1317_v49 = vld [vmem:[#allocation2] sm:$0xff] }
0x1d73   :  { %1412 = vmatmul.msk.f32.vlgmr.msra.gmra.mxu0 %vm122_vm6, %v1317_v49 }
0x1dd7   :  { %v1314_v50 = vpop.permute.xlu1 %1313 }
0x1dd8   :  { %1316 = vst.msk [vmem:[#allocation2 + $0x8] sm:$0xc0] %vm410_vm12, %v1314_v50 }
0x1ddf   :  { %v1318_v51 = vld [vmem:[#allocation2 + $0x8] sm:$0xff] }
0x1de0   :  { %1413 = vmatmul.msk.f32.gmra.mxu0 %vm122_vm6, %v1318_v51 }
0x1df0   :  { %v1350_v53 = vpop.f32.mrf.mxu0 }
0x1df1   :  { %v1351_v54 = vadd.f32 %v1427_v52, %v1350_v53 }
0x1df3   :  { %1356 = vst.msk [vmem:[#allocation9] sm:$0xff] %vm92_vm0, %v1351_v54 }
0x1e5d   :  { %v1353_v55 = vpop.f32.mrf.mxu0 }
0x1e5e   :  { %v1354_v57 = vadd.f32 %v1427_v52, %v1353_v55 }
0x1e60   :  { %1357 = vst.msk [vmem:[#allocation9 + $0x8] sm:$0xff] %vm92_vm0, %v1354_v57 }
0x1e61   :  { %1370 = dma.vmem_to_hbm [thread:$0]  %s1363_s25, 256, %s1365_s28, [#allocation5], %s1659_s17, %s1659_s17, %s1660_s18  }
0x1e62   :  { %1656 = dma.done.wait [#allocation5], 256  }
0x1e63   :  { %1657 = vsyncadd [#allocation5], 4294967040 }
0x1e64   :  { %1375 = vsyncpa [#allocation4], 1 }
0x1e65   :  { %1376 = vsyncpa [#allocation7], 1 }
0x1e66   :  { %1377 = vsyncpa [#allocation5], 1 }

</bundles_post_ra>
